<compile_context>
chip_gen: v7x
topology: tpu7x:2x2x1
jax: 0.10.0
libtpu: 0.0.40
codegen_flags: <defaults>
</compile_context>

<pallas_src>
import functools

import jax
import jax.numpy as jnp
import numpy as np
from jax.experimental import pallas as pl
from jax.experimental.pallas import tpu as pltpu


def _round_up(x, m):
    return ((x + m - 1) // m) * m


def _cdiv(a, b):
    return (a + b - 1) // b


def _layer_dims(input_dim, latent_dim, condition_dim, h0, h1):
    # (in_features, out_features) per fused layer, in execution order.
    return (
        (input_dim, h0),                    # encoder Linear 1
        (h0, h1),                           # encoder Linear 2
        (h1, 2 * latent_dim),               # fused [mu | logvar] head
        (latent_dim + condition_dim, h1),   # decoder Linear 1 (fused z|cond)
        (h1, h0),                           # decoder Linear 2
        (h0, input_dim),                    # decoder Linear 3
    )


def _slab_layout(layer_dims):
    """Row offsets for each layer's weight block in the packed weight slab.
    Rows are padded to multiples of 16 (bf16 sublane packing) so every static
    slice starts on a clean sublane boundary."""
    offs = []
    r = 0
    for (k, _) in layer_dims:
        offs.append(r)
        r += _round_up(k, 16)
    c_max = max(n for _, n in layer_dims)
    return tuple(offs), r, c_max


def cvae_kernel(x_ref, cond_ref, eps_ref, w_ref, b_ref, out_ref, zc_ref, *,
                layer_dims, row_offs, input_dim, latent_dim):
    def linear(a, idx):
        k, n = layer_dims[idx]
        r0 = row_offs[idx]
        w = w_ref[r0:r0 + k, 0:n]            # static slice of resident bf16 slab
        b = b_ref[idx:idx + 1, 0:n]          # static slice of resident f32 slab
        return jnp.dot(a.astype(jnp.bfloat16), w,
                       preferred_element_type=jnp.float32) + b

    x = x_ref[...]        # bf16
    eps = eps_ref[...]    # f32

    # ---- encoder: Linear + ReLU, Linear + ReLU (elementwise in f32) ----
    h = jnp.maximum(linear(x, 0), 0.0)
    h = jnp.maximum(linear(h, 1), 0.0)

    # ---- fused latent heads: one matmul -> packed [mu | logvar] ----
    mulv = linear(h, 2)
    mu = mulv[:, :latent_dim]
    logvar = mulv[:, latent_dim:]

    # ---- reparameterize: z = mu + eps * exp(0.5 * logvar) (f32, EUP exp) ----
    z = mu + eps * jnp.exp(0.5 * logvar)

    # ---- decoder: pack z|cond into bf16 scratch, one fused matmul ----
    zc_ref[:, 0:latent_dim] = z.astype(jnp.bfloat16)
    zc_ref[:, latent_dim:] = cond_ref[...]
    d = jnp.maximum(linear(zc_ref[...], 3), 0.0)
    d = jnp.maximum(linear(d, 4), 0.0)
    recon = linear(d, 5)

    # ---- packed output slab: [recon | mu | logvar] ----
    out_ref[:, 0:input_dim] = recon
    out_ref[:, input_dim:] = mulv


@functools.partial(jax.jit, static_argnames=("hidden_layers", "block_b"))
def cvae_forward(x, cond, eps, w_slab, b_slab, *, hidden_layers, block_b=2048):
    B, input_dim = x.shape
    condition_dim = cond.shape[1]
    latent_dim = eps.shape[1]
    h0, h1 = hidden_layers

    layer_dims = _layer_dims(input_dim, latent_dim, condition_dim, h0, h1)
    row_offs, n_rows, c_max = _slab_layout(layer_dims)
    assert w_slab.shape == (n_rows, c_max)

    # Matmul operands are bf16 anyway -> carry x / cond in bf16 (halves the
    # HBM read bytes of the two largest inputs). eps stays f32.
    if x.dtype != jnp.bfloat16:
        x = x.astype(jnp.bfloat16)
    if cond.dtype != jnp.bfloat16:
        cond = cond.astype(jnp.bfloat16)
    if eps.dtype != jnp.float32:
        eps = eps.astype(jnp.float32)

    # Batch tile: big (amortizes per-step overhead on single-TC v5e/v6e, VMEM
    # is a non-issue at these feature dims) but capped so the grid always has
    # >= 2 steps -> both v7x TensorCores are used via the "parallel" axis.
    if B <= 8:
        tb = B
    else:
        tb = max(8, min(block_b, _round_up(_cdiv(B, 2), 8)))
    grid = (_cdiv(B, tb),)          # no wrapper padding; ragged last block OK

    out_cols = input_dim + 2 * latent_dim

    kernel = functools.partial(
        cvae_kernel, layer_dims=layer_dims, row_offs=row_offs,
        input_dim=input_dim, latent_dim=latent_dim)

    def batch_spec(f):
        return pl.BlockSpec((tb, f), lambda i: (i, 0))

    def resident_spec(a):
        # Full array, constant block index -> DMA'd once, stays in VMEM.
        return pl.BlockSpec(a.shape, lambda i: (0, 0))

    flops = 2 * B * sum(k * n for k, n in layer_dims)
    bytes_accessed = (x.size * x.dtype.itemsize
                      + cond.size * cond.dtype.itemsize
                      + eps.size * eps.dtype.itemsize
                      + w_slab.size * w_slab.dtype.itemsize
                      + b_slab.size * b_slab.dtype.itemsize
                      + B * out_cols * 4)
    cost = pl.CostEstimate(flops=int(flops),
                           transcendentals=int(B * latent_dim),
                           bytes_accessed=int(bytes_accessed))

    out = pl.pallas_call(
        kernel,
        grid=grid,
        in_specs=[batch_spec(input_dim), batch_spec(condition_dim),
                  batch_spec(latent_dim),
                  resident_spec(w_slab), resident_spec(b_slab)],
        out_specs=pl.BlockSpec((tb, out_cols), lambda i: (i, 0)),
        out_shape=jax.ShapeDtypeStruct((B, out_cols), jnp.float32),
        scratch_shapes=[pltpu.VMEM((tb, latent_dim + condition_dim),
                                   jnp.bfloat16)],
        compiler_params=pltpu.CompilerParams(
            dimension_semantics=("parallel",),      # megacore on v7x
            vmem_limit_bytes=32 * 1024 * 1024,
        ),
        cost_estimate=cost,
    )(x, cond, eps, w_slab, b_slab)

    recon = out[:, :input_dim]
    mu = out[:, input_dim:input_dim + latent_dim]
    logvar = out[:, input_dim + latent_dim:]
    return recon, mu, logvar


def init_params(key, input_dim, latent_dim, condition_dim, hidden_layers):
    """PyTorch-style init U(-1/sqrt(fan_in), 1/sqrt(fan_in)). Weights stored
    as [in, out] and packed into one bf16 slab (16-row-aligned blocks); biases
    packed into one f32 [8, c_max] slab (row i = layer i)."""
    h0, h1 = hidden_layers
    layer_dims = _layer_dims(input_dim, latent_dim, condition_dim, h0, h1)
    row_offs, n_rows, c_max = _slab_layout(layer_dims)

    def linear(key, fan_in, fan_out):
        kw, kb = jax.random.split(key)
        bound = 1.0 / np.sqrt(fan_in)
        w = jax.random.uniform(kw, (fan_in, fan_out), jnp.float32, -bound, bound)
        b = jax.random.uniform(kb, (fan_out,), jnp.float32, -bound, bound)
        return w, b

    keys = jax.random.split(key, 7)
    w1, b1 = linear(keys[0], input_dim, h0)
    w2, b2 = linear(keys[1], h0, h1)
    wmu, bmu = linear(keys[2], h1, latent_dim)
    wlv, blv = linear(keys[3], h1, latent_dim)
    wd1, bd1 = linear(keys[4], latent_dim + condition_dim, h1)
    wd2, bd2 = linear(keys[5], h1, h0)
    wd3, bd3 = linear(keys[6], h0, input_dim)

    wml = jnp.concatenate([wmu, wlv], axis=1)   # fused [mu | logvar] head
    bml = jnp.concatenate([bmu, blv], axis=0)

    ws = [w1, w2, wml, wd1, wd2, wd3]
    bs = [b1, b2, bml, bd1, bd2, bd3]

    w_slab = jnp.zeros((n_rows, c_max), jnp.float32)
    for (k, n), off, w in zip(layer_dims, row_offs, ws):
        w_slab = w_slab.at[off:off + k, :n].set(w)
    w_slab = w_slab.astype(jnp.bfloat16)

    b_slab = jnp.zeros((8, c_max), jnp.float32)
    for i, ((k, n), b) in enumerate(zip(layer_dims, bs)):
        b_slab = b_slab.at[i, :n].set(b)

    return w_slab, b_slab


def cvae_forward_ref(x, cond, eps, w_slab, b_slab, *, hidden_layers):
    """Pure-JAX reference matching the PyTorch forward (same bf16 operand
    quantization / f32 accumulation as the kernel)."""
    input_dim = x.shape[1]
    condition_dim = cond.shape[1]
    latent_dim = eps.shape[1]
    h0, h1 = hidden_layers
    layer_dims = _layer_dims(input_dim, latent_dim, condition_dim, h0, h1)
    row_offs, _, _ = _slab_layout(layer_dims)

    def linear(a, idx):
        k, n = layer_dims[idx]
        r0 = row_offs[idx]
        w = w_slab[r0:r0 + k, :n]
        b = b_slab[idx, :n]
        return jnp.dot(a.astype(jnp.bfloat16), w,
                       preferred_element_type=jnp.float32) + b

    eps = eps.astype(jnp.float32)
    h = jax.nn.relu(linear(x, 0))
    h = jax.nn.relu(linear(h, 1))
    mulv = linear(h, 2)
    mu, logvar = mulv[:, :latent_dim], mulv[:, latent_dim:]
    z = mu + eps * jnp.exp(0.5 * logvar)
    zc = jnp.concatenate([z.astype(jnp.bfloat16),
                          cond.astype(jnp.bfloat16)], axis=1)
    d = jax.nn.relu(linear(zc, 3))
    d = jax.nn.relu(linear(d, 4))
    recon = linear(d, 5)
    return recon, mu, logvar


if __name__ == "__main__":
    # Small shapes consistent with the module; batch chosen so the grid has
    # exactly 2 steps (tb = round_up(cdiv(512,2), 8) = 256), no ragged block.
    batch = 512
    input_dim = 32
    latent_dim = 16
    condition_dim = 8
    hidden_layers = (64, 48)

    key = jax.random.PRNGKey(0)
    k_param, k_x, k_c, k_eps = jax.random.split(key, 4)

    w_slab, b_slab = init_params(k_param, input_dim, latent_dim,
                                 condition_dim, hidden_layers)

    # x / cond in bf16 (what the matmuls consume); eps ~ N(0,1) in f32
    # (equivalent of torch.randn_like, drawn outside the kernel).
    x = jax.random.normal(k_x, (batch, input_dim), jnp.float32).astype(jnp.bfloat16)
    cond = jax.random.normal(k_c, (batch, condition_dim), jnp.float32).astype(jnp.bfloat16)
    eps = jax.random.normal(k_eps, (batch, latent_dim), jnp.float32)

    recon, mu, logvar = cvae_forward(x, cond, eps, w_slab, b_slab,
                                     hidden_layers=hidden_layers)
    jax.block_until_ready((recon, mu, logvar))

    recon_r, mu_r, logvar_r = cvae_forward_ref(x, cond, eps, w_slab, b_slab,
                                               hidden_layers=hidden_layers)
    np.testing.assert_allclose(np.asarray(recon), np.asarray(recon_r),
                               rtol=5e-3, atol=5e-3)
    np.testing.assert_allclose(np.asarray(mu), np.asarray(mu_r),
                               rtol=5e-3, atol=5e-3)
    np.testing.assert_allclose(np.asarray(logvar), np.asarray(logvar_r),
                               rtol=5e-3, atol=5e-3)

    print("KERNEL_OK")
</pallas_src>

<mosaic_0001>
module attributes {stable_mosaic.version = 11 : i64} {
  func.func @cvae_kernel(%arg0: i32, %arg1: memref<256x32xbf16, #tpu.memory_space<vmem>>, %arg2: memref<256x8xbf16, #tpu.memory_space<vmem>>, %arg3: memref<256x16xf32, #tpu.memory_space<vmem>>, %arg4: memref<288x64xbf16, #tpu.memory_space<vmem>>, %arg5: memref<8x64xf32, #tpu.memory_space<vmem>>, %arg6: memref<256x64xf32, #tpu.memory_space<vmem>>, %arg7: memref<256x24xbf16, #tpu.memory_space<vmem>>) attributes {dimension_semantics = [#tpu.dimension_semantics<parallel>], iteration_bounds = array<i64: 2>, scalar_prefetch = 0 : i64, scratch_operands = 1 : i64, tpu.core_type = #tpu.core_type<tc>, window_params = [{transform_indices = @transform_0, window_bounds = array<i64: 256, 32>}, {transform_indices = @transform_1, window_bounds = array<i64: 256, 8>}, {transform_indices = @transform_2, window_bounds = array<i64: 256, 16>}, {pipeline_mode = #tpu.pipeline_mode<synchronous>, transform_indices = @transform_3, window_bounds = array<i64: 288, 64>}, {pipeline_mode = #tpu.pipeline_mode<synchronous>, transform_indices = @transform_4, window_bounds = array<i64: 8, 64>}, {transform_indices = @transform_5, window_bounds = array<i64: 256, 64>}]} {
    %c0 = arith.constant 0 : index
    %c0_0 = arith.constant 0 : index
    %0 = vector.load %arg1[%c0, %c0_0] : memref<256x32xbf16, #tpu.memory_space<vmem>>, vector<256x32xbf16>
    %c0_1 = arith.constant 0 : index
    %c0_2 = arith.constant 0 : index
    %1 = vector.load %arg3[%c0_1, %c0_2] : memref<256x16xf32, #tpu.memory_space<vmem>>, vector<256x16xf32>
    %c0_3 = arith.constant 0 : index
    %c0_4 = arith.constant 0 : index
    %2 = vector.load %arg4[%c0_3, %c0_4] : memref<288x64xbf16, #tpu.memory_space<vmem>>, vector<32x64xbf16>
    %c0_5 = arith.constant 0 : index
    %c0_6 = arith.constant 0 : index
    %3 = vector.load %arg5[%c0_5, %c0_6] : memref<8x64xf32, #tpu.memory_space<vmem>>, vector<1x64xf32>
    %cst = arith.constant dense<0.000000e+00> : vector<256x64xf32>
    %4 = tpu.matmul %0, %2, %cst {dimension_numbers = #tpu.dot_dimension_numbers<[1], [0], [0], [1], [0, 0, 1, 1], [], []>} : vector<256x32xbf16>, vector<32x64xbf16>, vector<256x64xf32> -> vector<256x64xf32>
    %5 = vector.broadcast %3 : vector<1x64xf32> to vector<256x64xf32>
    %6 = arith.addf %4, %5 : vector<256x64xf32>
    %cst_7 = arith.constant 0.000000e+00 : f32
    %7 = vector.broadcast %cst_7 : f32 to vector<256x64xf32>
    %8 = arith.maximumf %6, %7 : vector<256x64xf32>
    %c32 = arith.constant 32 : index
    %c0_8 = arith.constant 0 : index
    %9 = vector.load %arg4[%c32, %c0_8] : memref<288x64xbf16, #tpu.memory_space<vmem>>, vector<64x48xbf16>
    %c1 = arith.constant 1 : index
    %c0_9 = arith.constant 0 : index
    %10 = vector.load %arg5[%c1, %c0_9] : memref<8x64xf32, #tpu.memory_space<vmem>>, vector<1x48xf32>
    %11 = arith.truncf %8 : vector<256x64xf32> to vector<256x64xbf16>
    %cst_10 = arith.constant dense<0.000000e+00> : vector<256x48xf32>
    %12 = tpu.matmul %11, %9, %cst_10 {dimension_numbers = #tpu.dot_dimension_numbers<[1], [0], [0], [1], [0, 0, 1, 1], [], []>} : vector<256x64xbf16>, vector<64x48xbf16>, vector<256x48xf32> -> vector<256x48xf32>
    %13 = vector.broadcast %10 : vector<1x48xf32> to vector<256x48xf32>
    %14 = arith.addf %12, %13 : vector<256x48xf32>
    %cst_11 = arith.constant 0.000000e+00 : f32
    %15 = vector.broadcast %cst_11 : f32 to vector<256x48xf32>
    %16 = arith.maximumf %14, %15 : vector<256x48xf32>
    %c96 = arith.constant 96 : index
    %c0_12 = arith.constant 0 : index
    %17 = vector.load %arg4[%c96, %c0_12] : memref<288x64xbf16, #tpu.memory_space<vmem>>, vector<48x32xbf16>
    %c2 = arith.constant 2 : index
    %c0_13 = arith.constant 0 : index
    %18 = vector.load %arg5[%c2, %c0_13] : memref<8x64xf32, #tpu.memory_space<vmem>>, vector<1x32xf32>
    %19 = arith.truncf %16 : vector<256x48xf32> to vector<256x48xbf16>
    %cst_14 = arith.constant dense<0.000000e+00> : vector<256x32xf32>
    %20 = tpu.matmul %19, %17, %cst_14 {dimension_numbers = #tpu.dot_dimension_numbers<[1], [0], [0], [1], [0, 0, 1, 1], [], []>} : vector<256x48xbf16>, vector<48x32xbf16>, vector<256x32xf32> -> vector<256x32xf32>
    %21 = vector.broadcast %18 : vector<1x32xf32> to vector<256x32xf32>
    %22 = arith.addf %20, %21 : vector<256x32xf32>
    %23 = vector.extract_strided_slice %22 {offsets = [0, 0], sizes = [256, 16], strides = [1, 1]} : vector<256x32xf32> to vector<256x16xf32>
    %24 = vector.extract_strided_slice %22 {offsets = [0, 16], sizes = [256, 16], strides = [1, 1]} : vector<256x32xf32> to vector<256x16xf32>
    %cst_15 = arith.constant 5.000000e-01 : f32
    %25 = vector.broadcast %cst_15 : f32 to vector<256x16xf32>
    %26 = arith.mulf %25, %24 : vector<256x16xf32>
    %27 = math.exp %26 : vector<256x16xf32>
    %28 = arith.mulf %1, %27 : vector<256x16xf32>
    %29 = arith.addf %23, %28 : vector<256x16xf32>
    %30 = arith.truncf %29 : vector<256x16xf32> to vector<256x16xbf16>
    %c0_16 = arith.constant 0 : index
    %c0_17 = arith.constant 0 : index
    %31 = vector.load %arg7[%c0_16, %c0_17] : memref<256x24xbf16, #tpu.memory_space<vmem>>, vector<256x16xbf16>
    tpu.vector_store %arg7[%c0_16, %c0_17], %30 {strides = array<i32>} : memref<256x24xbf16, #tpu.memory_space<vmem>>, vector<256x16xbf16>,
    %c0_18 = arith.constant 0 : index
    %c0_19 = arith.constant 0 : index
    %32 = vector.load %arg2[%c0_18, %c0_19] : memref<256x8xbf16, #tpu.memory_space<vmem>>, vector<256x8xbf16>
    %c0_20 = arith.constant 0 : index
    %c16 = arith.constant 16 : index
    %33 = vector.load %arg7[%c0_20, %c16] : memref<256x24xbf16, #tpu.memory_space<vmem>>, vector<256x8xbf16>
    tpu.vector_store %arg7[%c0_20, %c16], %32 {strides = array<i32>} : memref<256x24xbf16, #tpu.memory_space<vmem>>, vector<256x8xbf16>,
    %c0_21 = arith.constant 0 : index
    %c0_22 = arith.constant 0 : index
    %34 = vector.load %arg7[%c0_21, %c0_22] : memref<256x24xbf16, #tpu.memory_space<vmem>>, vector<256x24xbf16>
    %c144 = arith.constant 144 : index
    %c0_23 = arith.constant 0 : index
    %35 = vector.load %arg4[%c144, %c0_23] : memref<288x64xbf16, #tpu.memory_space<vmem>>, vector<24x48xbf16>
    %c3 = arith.constant 3 : index
    %c0_24 = arith.constant 0 : index
    %36 = vector.load %arg5[%c3, %c0_24] : memref<8x64xf32, #tpu.memory_space<vmem>>, vector<1x48xf32>
    %cst_25 = arith.constant dense<0.000000e+00> : vector<256x48xf32>
    %37 = tpu.matmul %34, %35, %cst_25 {dimension_numbers = #tpu.dot_dimension_numbers<[1], [0], [0], [1], [0, 0, 1, 1], [], []>} : vector<256x24xbf16>, vector<24x48xbf16>, vector<256x48xf32> -> vector<256x48xf32>
    %38 = vector.broadcast %36 : vector<1x48xf32> to vector<256x48xf32>
    %39 = arith.addf %37, %38 : vector<256x48xf32>
    %cst_26 = arith.constant 0.000000e+00 : f32
    %40 = vector.broadcast %cst_26 : f32 to vector<256x48xf32>
    %41 = arith.maximumf %39, %40 : vector<256x48xf32>
    %c176 = arith.constant 176 : index
    %c0_27 = arith.constant 0 : index
    %42 = vector.load %arg4[%c176, %c0_27] : memref<288x64xbf16, #tpu.memory_space<vmem>>, vector<48x64xbf16>
    %c4 = arith.constant 4 : index
    %c0_28 = arith.constant 0 : index
    %43 = vector.load %arg5[%c4, %c0_28] : memref<8x64xf32, #tpu.memory_space<vmem>>, vector<1x64xf32>
    %44 = arith.truncf %41 : vector<256x48xf32> to vector<256x48xbf16>
    %cst_29 = arith.constant dense<0.000000e+00> : vector<256x64xf32>
    %45 = tpu.matmul %44, %42, %cst_29 {dimension_numbers = #tpu.dot_dimension_numbers<[1], [0], [0], [1], [0, 0, 1, 1], [], []>} : vector<256x48xbf16>, vector<48x64xbf16>, vector<256x64xf32> -> vector<256x64xf32>
    %46 = vector.broadcast %43 : vector<1x64xf32> to vector<256x64xf32>
    %47 = arith.addf %45, %46 : vector<256x64xf32>
    %cst_30 = arith.constant 0.000000e+00 : f32
    %48 = vector.broadcast %cst_30 : f32 to vector<256x64xf32>
    %49 = arith.maximumf %47, %48 : vector<256x64xf32>
    %c224 = arith.constant 224 : index
    %c0_31 = arith.constant 0 : index
    %50 = vector.load %arg4[%c224, %c0_31] : memref<288x64xbf16, #tpu.memory_space<vmem>>, vector<64x32xbf16>
    %c5 = arith.constant 5 : index
    %c0_32 = arith.constant 0 : index
    %51 = vector.load %arg5[%c5, %c0_32] : memref<8x64xf32, #tpu.memory_space<vmem>>, vector<1x32xf32>
    %52 = arith.truncf %49 : vector<256x64xf32> to vector<256x64xbf16>
    %cst_33 = arith.constant dense<0.000000e+00> : vector<256x32xf32>
    %53 = tpu.matmul %52, %50, %cst_33 {dimension_numbers = #tpu.dot_dimension_numbers<[1], [0], [0], [1], [0, 0, 1, 1], [], []>} : vector<256x64xbf16>, vector<64x32xbf16>, vector<256x32xf32> -> vector<256x32xf32>
    %54 = vector.broadcast %51 : vector<1x32xf32> to vector<256x32xf32>
    %55 = arith.addf %53, %54 : vector<256x32xf32>
    %c0_34 = arith.constant 0 : index
    %c0_35 = arith.constant 0 : index
    %56 = vector.load %arg6[%c0_34, %c0_35] : memref<256x64xf32, #tpu.memory_space<vmem>>, vector<256x32xf32>
    tpu.vector_store %arg6[%c0_34, %c0_35], %55 {strides = array<i32>} : memref<256x64xf32, #tpu.memory_space<vmem>>, vector<256x32xf32>,
    %c0_36 = arith.constant 0 : index
    %c32_37 = arith.constant 32 : index
    %57 = vector.load %arg6[%c0_36, %c32_37] : memref<256x64xf32, #tpu.memory_space<vmem>>, vector<256x32xf32>
    tpu.vector_store %arg6[%c0_36, %c32_37], %22 {strides = array<i32>} : memref<256x64xf32, #tpu.memory_space<vmem>>, vector<256x32xf32>,
    return
  }
  func.func @transform_0(%arg0: i32) -> (i32, i32) {
    %c0_i32 = arith.constant 0 : i32
    %c0_i32_0 = arith.constant 0 : i32
    return %arg0, %c0_i32 : i32, i32
  }
  func.func @transform_1(%arg0: i32) -> (i32, i32) {
    %c0_i32 = arith.constant 0 : i32
    %c0_i32_0 = arith.constant 0 : i32
    return %arg0, %c0_i32 : i32, i32
  }
  func.func @transform_2(%arg0: i32) -> (i32, i32) {
    %c0_i32 = arith.constant 0 : i32
    %c0_i32_0 = arith.constant 0 : i32
    return %arg0, %c0_i32 : i32, i32
  }
  func.func @transform_3(%arg0: i32) -> (i32, i32) {
    %c0_i32 = arith.constant 0 : i32
    %c0_i32_0 = arith.constant 0 : i32
    %c0_i32_1 = arith.constant 0 : i32
    return %c0_i32, %c0_i32_0 : i32, i32
  }
  func.func @transform_4(%arg0: i32) -> (i32, i32) {
    %c0_i32 = arith.constant 0 : i32
    %c0_i32_0 = arith.constant 0 : i32
    %c0_i32_1 = arith.constant 0 : i32
    return %c0_i32, %c0_i32_0 : i32, i32
  }
  func.func @transform_5(%arg0: i32) -> (i32, i32) {
    %c0_i32 = arith.constant 0 : i32
    %c0_i32_0 = arith.constant 0 : i32
    return %arg0, %c0_i32 : i32, i32
  }
}

</mosaic_0001>

<bundles_post_ra>
// kernel: cvae_forward.1
= control target key start
LH: loop header
LB: loop body
LE: loop exit
PB: predicated region body
PF: predicated region fallthrough
CT: control target
= control target key end

     0   :  { %s3504_s18 = smov 0   ;;  %s4419_s0 = inlined_call_operand.vmem [shape: bf16[512,32], index: 0, kind: input, shape index: {}]   ;;  %s4420_s1 = inlined_call_operand.vmem [shape: bf16[512,8], index: 1, kind: input, shape index: {}]   ;;  %s4421_s2 = inlined_call_operand.vmem [shape: f32[512,16], index: 2, kind: input, shape index: {}]   ;;  %s4422_s3 = inlined_call_operand.vmem [shape: bf16[288,64], index: 3, kind: input, shape index: {}]   ;;  %s4423_s4 = inlined_call_operand.vmem [shape: f32[8,64], index: 4, kind: input, shape index: {}]   ;;  %s4424_s5 = inlined_call_operand.vmem [shape: f32[512,64], index: 5, kind: output, shape index: {}]  }
   0x1 LB: > { %s2828_s19 = sadd.s32 4294967295, %s3469_s18   ;;  %p2832_p0 = scmp.ge.s32.totalorder %s3469_s18, 1  ;;  %s3469_s18 = sphi %s3504_s18, %s15_s18  }
   0x2   : > { %p210_p1 = scmp.lt.s32.totalorder %s3469_s18, 3 }
   0x4   : > { %p211_p2 = pnand %p2832_p0, %p210_p1 }
   0x5   : > { %v3349_v0 = vld [vmem:[%s4422_s3] sm:$0xff] (!%p211_p2)   ;;  %s2833_s22 = sshll.u32 (!%p211_p2), %s2828_s19, 5  ;;  %v3350_v1 = vld [vmem:[%s4422_s3 + $0x8] sm:$0xff] (!%p211_p2)   ;;  %v3367_v2 = vld [vmem:[%s4422_s3 + $0x10] sm:$0xff] (!%p211_p2)   ;;  %vm438_vm0 = vcmask (!%p211_p2), 261120   ;;  %vm733_vm1 = vcmask (!%p211_p2), 523264  }
   0x6   : > { %214 = sbr.rel (%p211_p2) target bundleno = 1550 (0x60e), region = 40  ;;  %p249_p3 = scmp.lt.s32.totalorder (!%p211_p2), %s2833_s22, 63  ;;  %3109 = vmatprep.subr.bf16.mxu0 (!%p211_p2), %v3349_v0  ;;  %v3368_v3 = vld [vmem:[%s4422_s3 + $0x18] sm:$0xff] (!%p211_p2)   ;;  %3145 = vmatprep.subr.bf16.mxu1 (!%p211_p2), %v3367_v2  ;;  %v3369_v20 = vld [vmem:[%s4422_s3 + $0x20] sm:$0xff] (!%p211_p2)   ;;  %v3370_v21 = vld [vmem:[%s4422_s3 + $0x28] sm:$0xff] (!%p211_p2)   ;;  %vm1020_vm2 = vcmask (!%p211_p2), 392192  }
   0x7   : > { %3110 = vmatpush3.bf16.msra.mxu0 (!%p211_p2), %v3349_v0  ;;  %3146 = vmatpush3.bf16.msra.mxu1 (!%p211_p2), %v3367_v2  ;;  %v3371_v22 = vld [vmem:[%s4422_s3 + $0x30] sm:$0xff] (!%p211_p2)   ;;  %v3372_v23 = vld [vmem:[%s4422_s3 + $0x38] sm:$0xff] (!%p211_p2)   ;;  %v3373_v24 = vld [vmem:[%s4422_s3 + $0x40] sm:$0xff] (!%p211_p2)   ;;  %s3471_s25 = smov (!%p211_p2), 16   ;;  %vm1810_vm3 = vcmask (!%p211_p2), 1043456   ;;  %s3472_s9 = smov (!%p211_p2), 112  }
   0x8   : > { %3111 = vmatprep.subr.bf16.mxu0 (!%p211_p2), %v3350_v1  ;;  %3147 = vmatprep.subr.bf16.mxu1 (!%p211_p2), %v3368_v3  ;;  %v3584_v25 = vld [vmem:[%s4423_s4] ss:$0 sm:$0xff] (!%p211_p2)  ;;  %s3473_s10 = smov (!%p211_p2), 32   ;;  %vm1534_vm4 = vcmask (!%p211_p2), 130048   ;;  %vm1711_vm5 = vcmask (!%p211_p2), 195712   ;;  %vm1761_vm6 = vcmask (!%p211_p2), 195584  }
   0x9   : > { %vm2715_vm7 = vcmask (!%p211_p2), 523520  }
   0xb   : > { %3112 = vmatpush3.bf16.msra.mxu0 (!%p211_p2), %v3350_v1  ;;  %3148 = vmatpush3.bf16.msra.mxu1 (!%p211_p2), %v3368_v3 }
   0xc   : > { %3149 = vmatprep.subr.bf16.mxu1 (!%p211_p2), %v3369_v20  ;;  %3185 = vmatprep.subr.bf16.mxu0 (!%p211_p2), %v3371_v22 }
   0xd   : > { %s4426_s22 = smov (!%p249_p3, %s2833_s22), 63 }
   0xe   : > { %s2834_s29 = sshll.u32 %s4426_s22, 2  ;;  %s2838_s11 = sshll.u32 %s4426_s22, 3 }
   0xf   : > { %s3532_s7 = scalar_lea.vmem %s4419_s0, %s2834_s29  ;;  %3150 = vmatpush3.bf16.msra.mxu1 %v3369_v20  ;;  %s3639_s24 = scalar_lea.vmem %s4420_s1, %s2834_s29 }
  0x10   : > { %v3351_v4 = vld [vmem:[%s3532_s7] sm:$0xff]   ;;  %v3352_v5 = vld [vmem:[%s3532_s7 + $0x8] sm:$0xff]   ;;  %v3353_v6 = vld [vmem:[%s3532_s7 + $0x10] sm:$0xff]   ;;  %3151 = vmatprep.subr.bf16.mxu1 %v3370_v21  ;;  %s3967_s14 = scalar_lea.vmem %s4421_s2, %s2838_s11  ;;  %s4254_s15 = scalar_lea.vmem %s4424_s5, %s2838_s11 }
  0x11   : > { %3113 = vmatprep.mubr.msk.bf16.mxu0 %vm438_vm0, %v3351_v4  ;;  %v3354_v7 = vld [vmem:[%s3532_s7 + $0x18] sm:$0xff]   ;;  %v3355_v8 = vld [vmem:[%s3532_s7 + $0x20] sm:$0xff]   ;;  %v3356_v9 = vld [vmem:[%s3532_s7 + $0x28] sm:$0xff]  }
  0x12   : > { %3114 = vmatmul.mubr.msk.bf16.vlgmr.msra.gmra.mrb[0].mxu0 %vm438_vm0, %v3352_v5  ;;  %v3357_v10 = vld [vmem:[%s3532_s7 + $0x30] sm:$0xff]   ;;  %v3358_v11 = vld [vmem:[%s3532_s7 + $0x38] sm:$0xff]   ;;  %v3359_v12 = vld [vmem:[%s3532_s7 + $0x40] sm:$0xff]  }
  0x13   : > { %3117 = vmatprep.mubr.msk.bf16.mxu0 %vm438_vm0, %v3353_v6  ;;  %v3360_v13 = vld [vmem:[%s3532_s7 + $0x48] sm:$0xff]   ;;  %v3361_v14 = vld [vmem:[%s3532_s7 + $0x50] sm:$0xff]   ;;  %v3362_v15 = vld [vmem:[%s3532_s7 + $0x58] sm:$0xff]   ;;  %3152 = vmatpush3.bf16.msra.mxu1 %v3370_v21 }
  0x14   : > { %v3363_v16 = vld [vmem:[%s3532_s7 + $0x60] sm:$0xff]   ;;  %v3364_v17 = vld [vmem:[%s3532_s7 + $0x68] sm:$0xff]   ;;  %v3365_v18 = vld [vmem:[%s3532_s7 + $0x70] sm:$0xff]   ;;  %3186 = vmatpush3.bf16.msra.mxu0 %v3371_v22 }
  0x15   : > { %v3366_v19 = vld [vmem:[%s3532_s7 + $0x78] sm:$0xff]   ;;  %3187 = vmatprep.subr.bf16.mxu0 %v3372_v23 }
  0x18   : > { %3188 = vmatpush3.bf16.msra.mxu0 %v3372_v23 }
  0x19   : > { %3189 = vmatprep.subr.bf16.mxu0 %v3373_v24 }
  0x1a   : > { %3118 = vmatmul.mubr.msk.bf16.gmra.mrb[4].mxu0 %vm438_vm0, %v3354_v7 }
  0x1b   : > { %3121 = vmatprep.mubr.msk.bf16.mxu0 %vm438_vm0, %v3355_v8 }
  0x1c   : > { %3190 = vmatpush3.bf16.msra.mxu0 %v3373_v24 }
  0x22   : > { %3122 = vmatmul.mubr.msk.bf16.gmra.mrb[8].mxu0 %vm438_vm0, %v3356_v9 }
  0x23   : > { %3125 = vmatprep.mubr.msk.bf16.mxu0 %vm438_vm0, %v3357_v10 }
  0x2a   : > { %3126 = vmatmul.mubr.msk.bf16.gmra.mrb[12].mxu0 %vm438_vm0, %v3358_v11 }
  0x2b   : > { %3129 = vmatprep.mubr.msk.bf16.mxu0 %vm438_vm0, %v3359_v12 }
  0x32   : > { %3130 = vmatmul.mubr.msk.bf16.gmra.mrb[16].mxu0 %vm438_vm0, %v3360_v13 }
  0x33   : > { %3133 = vmatprep.mubr.msk.bf16.mxu0 %vm438_vm0, %v3361_v14 }
  0x3a   : > { %3134 = vmatmul.mubr.msk.bf16.gmra.mrb[20].mxu0 %vm438_vm0, %v3362_v15 }
  0x3b   : > { %3137 = vmatprep.mubr.msk.bf16.mxu0 %vm438_vm0, %v3363_v16 }
  0x42   : > { %3138 = vmatmul.mubr.msk.bf16.gmra.mrb[24].mxu0 %vm438_vm0, %v3364_v17 }
  0x43   : > { %3141 = vmatprep.mubr.msk.bf16.mxu0 %vm438_vm0, %v3365_v18 }
  0x4a   : > { %3142 = vmatmul.mubr.msk.bf16.gmra.mrb[28].mxu0 %vm438_vm0, %v3366_v19 }
  0xe5   : > { %v3115_v26 = vpop.f32.mrb[0].mxu0 }
  0xe6   : > { %v530_v27 = vadd.f32 %v3115_v26, %v3584_v25  ;;  %v521_v28 = vpop.f32.mrb[1].mxu0 }
  0xe7   : > { %v522_v29 = vadd.f32 %v3584_v25, %v521_v28  ;;  %v3116_v30 = vpop.f32.mrb[2].mxu0 }
  0xe8   : > { %v533_v31 = vadd.f32 %v3116_v30, %v3584_v25  ;;  %v524_v32 = vpop.f32.mrb[3].mxu0  ;;  %v650_v34 = vmax.f32 %v530_v27, 0.0 }
  0xe9   : > { %v525_v33 = vadd.f32 %v3584_v25, %v524_v32  ;;  %v648_v36 = vmax.f32 %v522_v29, 0.0 }
  0xea   : > { %v651_v35 = vmax.f32 %v533_v31, 0.0 }
  0xeb   : > { %v649_v37 = vmax.f32 %v525_v33, 0.0 }
  0xec   : > { %v690_v38 = vpack.c.bf16 %v651_v35, %v650_v34 }
  0xed   : > { %v3119_v39 = vpop.f32.mrb[4].mxu0  ;;  %v689_v40 = vpack.c.bf16 %v649_v37, %v648_v36 }
  0xee   : > { %v546_v41 = vadd.f32 %v3119_v39, %v3584_v25  ;;  %v537_v42 = vpop.f32.mrb[5].mxu0 }
  0xef   : > { %v538_v43 = vadd.f32 %v3584_v25, %v537_v42  ;;  %v3120_v44 = vpop.f32.mrb[6].mxu0  ;;  %3153 = vmatprep.mubr.msk.bf16.mxu1 %vm733_vm1, %v689_v40 }
  0xf0   : > { %v549_v45 = vadd.f32 %v3120_v44, %v3584_v25  ;;  %v540_v46 = vpop.f32.mrb[7].mxu0  ;;  %3154 = vmatmul.mubr.msk.bf16.vlgmr.msra.gmra.mrb[0].mxu1 %vm733_vm1, %v690_v38  ;;  %v654_v48 = vmax.f32 %v546_v41, 0.0 }
  0xf1   : > { %v541_v47 = vadd.f32 %v3584_v25, %v540_v46  ;;  %v652_v50 = vmax.f32 %v538_v43, 0.0 }
  0xf2   : > { %v655_v49 = vmax.f32 %v549_v45, 0.0 }
  0xf3   : > { %v653_v51 = vmax.f32 %v541_v47, 0.0 }
  0xf4   : > { %v692_v52 = vpack.c.bf16 %v655_v49, %v654_v48 }
  0xf5   : > { %v691_v53 = vpack.c.bf16 %v653_v51, %v652_v50  ;;  %v3123_v54 = vpop.f32.mrb[8].mxu0 }
  0xf6   : > { %v562_v55 = vadd.f32 %v3123_v54, %v3584_v25  ;;  %v553_v56 = vpop.f32.mrb[9].mxu0 }
  0xf7   : > { %v554_v57 = vadd.f32 %v3584_v25, %v553_v56  ;;  %v3124_v58 = vpop.f32.mrb[10].mxu0  ;;  %3157 = vmatprep.mubr.msk.bf16.mxu1 %vm733_vm1, %v691_v53 }
  0xf8   : > { %v565_v59 = vadd.f32 %v3124_v58, %v3584_v25  ;;  %v556_v60 = vpop.f32.mrb[11].mxu0  ;;  %3158 = vmatmul.mubr.msk.bf16.gmra.mrb[4].mxu1 %vm733_vm1, %v692_v52  ;;  %v658_v62 = vmax.f32 %v562_v55, 0.0 }
  0xf9   : > { %v557_v61 = vadd.f32 %v3584_v25, %v556_v60  ;;  %v656_v0 = vmax.f32 %v554_v57, 0.0 }
  0xfa   : > { %v659_v63 = vmax.f32 %v565_v59, 0.0 }
  0xfb   : > { %v657_v1 = vmax.f32 %v557_v61, 0.0 }
  0xfc   : > { %v694_v2 = vpack.c.bf16 %v659_v63, %v658_v62 }
  0xfd   : > { %v693_v3 = vpack.c.bf16 %v657_v1, %v656_v0  ;;  %v3127_v4 = vpop.f32.mrb[12].mxu0 }
  0xfe   : > { %v578_v5 = vadd.f32 %v3127_v4, %v3584_v25  ;;  %v569_v6 = vpop.f32.mrb[13].mxu0 }
  0xff   : > { %v570_v7 = vadd.f32 %v3584_v25, %v569_v6  ;;  %v3128_v8 = vpop.f32.mrb[14].mxu0  ;;  %3161 = vmatprep.mubr.msk.bf16.mxu1 %vm733_vm1, %v693_v3 }
 0x100   : > { %v581_v9 = vadd.f32 %v3128_v8, %v3584_v25  ;;  %v572_v10 = vpop.f32.mrb[15].mxu0  ;;  %3162 = vmatmul.mubr.msk.bf16.gmra.mrb[8].mxu1 %vm733_vm1, %v694_v2  ;;  %v662_v12 = vmax.f32 %v578_v5, 0.0 }
 0x101   : > { %v573_v11 = vadd.f32 %v3584_v25, %v572_v10  ;;  %v660_v14 = vmax.f32 %v570_v7, 0.0 }
 0x102   : > { %v663_v13 = vmax.f32 %v581_v9, 0.0 }
 0x103   : > { %v661_v15 = vmax.f32 %v573_v11, 0.0  ;;  %v3374_v11 = vld [vmem:[%s3639_s24 + $0x8] sm:$0xff]  }
 0x104   : > { %v696_v16 = vpack.c.bf16 %v663_v13, %v662_v12  ;;  %1665 = vrot.lane.b32.xlu1 %v3374_v11, %s3471_s25  ;;  %v3376_v12 = vld [vmem:[%s3639_s24 + $0x18] sm:$0xff]   ;;  %v3377_v13 = vld [vmem:[%s3639_s24 + $0x10] sm:$0xff]  }
 0x105   : > { %v695_v17 = vpack.c.bf16 %v661_v15, %v660_v14  ;;  %v3131_v18 = vpop.f32.mrb[16].mxu0  ;;  %v3652_v14 = vld [vmem:[%s4423_s4 + $0x1] ss:$0 sm:$0xff] }
 0x106   : > { %v594_v19 = vadd.f32 %v3131_v18, %v3584_v25  ;;  %v585_v20 = vpop.f32.mrb[17].mxu0 }
 0x107   : > { %v586_v21 = vadd.f32 %v3584_v25, %v585_v20  ;;  %v3132_v22 = vpop.f32.mrb[18].mxu0  ;;  %3165 = vmatprep.mubr.msk.bf16.mxu1 %vm733_vm1, %v695_v17 }
 0x108   : > { %v597_v23 = vadd.f32 %v3132_v22, %v3584_v25  ;;  %v588_v24 = vpop.f32.mrb[19].mxu0  ;;  %3166 = vmatmul.mubr.msk.bf16.gmra.mrb[12].mxu1 %vm733_vm1, %v696_v16  ;;  %v666_v27 = vmax.f32 %v594_v19, 0.0  ;;  %1669 = vrot.lane.b32.xlu1 %v3376_v12, %s3471_s25 }
 0x109   : > { %v589_v26 = vadd.f32 %v3584_v25, %v588_v24  ;;  %v664_v29 = vmax.f32 %v586_v21, 0.0 }
 0x10a   : > { %v667_v28 = vmax.f32 %v597_v23, 0.0 }
 0x10b   : > { %v665_v30 = vmax.f32 %v589_v26, 0.0 }
 0x10c   : > { %v698_v31 = vpack.c.bf16 %v667_v28, %v666_v27 }
 0x10d   : > { %v697_v32 = vpack.c.bf16 %v665_v30, %v664_v29  ;;  %v3135_v33 = vpop.f32.mrb[20].mxu0 }
 0x10e   : > { %v610_v34 = vadd.f32 %v3135_v33, %v3584_v25  ;;  %v601_v35 = vpop.f32.mrb[21].mxu0 }
 0x10f   : > { %v602_v36 = vadd.f32 %v3584_v25, %v601_v35  ;;  %v3136_v37 = vpop.f32.mrb[22].mxu0  ;;  %3169 = vmatprep.mubr.msk.bf16.mxu1 %vm733_vm1, %v697_v32 }
 0x110   : > { %v613_v38 = vadd.f32 %v3136_v37, %v3584_v25  ;;  %v604_v39 = vpop.f32.mrb[23].mxu0  ;;  %3170 = vmatmul.mubr.msk.bf16.gmra.mrb[16].mxu1 %vm733_vm1, %v698_v31  ;;  %v670_v41 = vmax.f32 %v610_v34, 0.0 }
 0x111   : > { %v605_v40 = vadd.f32 %v3584_v25, %v604_v39  ;;  %v668_v43 = vmax.f32 %v602_v36, 0.0 }
 0x112   : > { %v671_v42 = vmax.f32 %v613_v38, 0.0 }
 0x113   : > { %v669_v44 = vmax.f32 %v605_v40, 0.0 }
 0x114   : > { %v700_v45 = vpack.c.bf16 %v671_v42, %v670_v41 }
 0x115   : > { %v699_v46 = vpack.c.bf16 %v669_v44, %v668_v43  ;;  %v3139_v47 = vpop.f32.mrb[24].mxu0 }
 0x116   : > { %v626_v48 = vadd.f32 %v3139_v47, %v3584_v25  ;;  %v617_v49 = vpop.f32.mrb[25].mxu0 }
 0x117   : > { %v618_v50 = vadd.f32 %v3584_v25, %v617_v49  ;;  %v3140_v51 = vpop.f32.mrb[26].mxu0  ;;  %3173 = vmatprep.mubr.msk.bf16.mxu1 %vm733_vm1, %v699_v46 }
 0x118   : > { %v629_v52 = vadd.f32 %v3140_v51, %v3584_v25  ;;  %v620_v53 = vpop.f32.mrb[27].mxu0  ;;  %3174 = vmatmul.mubr.msk.bf16.gmra.mrb[20].mxu1 %vm733_vm1, %v700_v45  ;;  %v674_v55 = vmax.f32 %v626_v48, 0.0 }
 0x119   : > { %v621_v54 = vadd.f32 %v3584_v25, %v620_v53  ;;  %v672_v57 = vmax.f32 %v618_v50, 0.0 }
 0x11a   : > { %v675_v56 = vmax.f32 %v629_v52, 0.0 }
 0x11b   : > { %v673_v58 = vmax.f32 %v621_v54, 0.0 }
 0x11c   : > { %v702_v59 = vpack.c.bf16 %v675_v56, %v674_v55 }
 0x11d   : > { %v701_v60 = vpack.c.bf16 %v673_v58, %v672_v57  ;;  %v3143_v61 = vpop.f32.mrb[28].mxu0 }
 0x11e   : > { %v642_v62 = vadd.f32 %v3143_v61, %v3584_v25  ;;  %v633_v63 = vpop.f32.mrb[29].mxu0 }
 0x11f   : > { %v634_v0 = vadd.f32 %v3584_v25, %v633_v63  ;;  %v3144_v1 = vpop.f32.mrb[30].mxu0  ;;  %3177 = vmatprep.mubr.msk.bf16.mxu1 %vm733_vm1, %v701_v60 }
 0x120   : > { %v678_v2 = vmax.f32 %v642_v62, 0.0  ;;  %v645_v3 = vadd.f32 %v3144_v1, %v3584_v25  ;;  %v636_v4 = vpop.f32.mrb[31].mxu0  ;;  %3178 = vmatmul.mubr.msk.bf16.gmra.mrb[24].mxu1 %vm733_vm1, %v702_v59 }
 0x121   : > { %v676_v5 = vmax.f32 %v634_v0, 0.0  ;;  %v637_v6 = vadd.f32 %v3584_v25, %v636_v4  ;;  %v3375_v25 = vld [vmem:[%s3639_s24] sm:$0xff]  }
 0x122   : > { %v679_v7 = vmax.f32 %v645_v3, 0.0  ;;  %1663 = vrot.lane.b32.xlu0 %v3375_v25, %s3471_s25 }
 0x123   : > { %v677_v8 = vmax.f32 %v637_v6, 0.0 }
 0x124   : > { %v704_v9 = vpack.c.bf16 %v679_v7, %v678_v2 }
 0x125   : > { %v703_v10 = vpack.c.bf16 %v677_v8, %v676_v5 }
 0x126   : > { %1667 = vrot.lane.b32.xlu0 %v3377_v13, %s3471_s25 }
 0x127   : > { %3181 = vmatprep.mubr.msk.bf16.mxu1 %vm733_vm1, %v703_v10 }
 0x128   : > { %3182 = vmatmul.mubr.msk.bf16.gmra.mrb[28].mxu1 %vm733_vm1, %v704_v9 }
 0x1c3   : > { %v3155_v15 = vpop.f32.mrb[0].mxu1 }
 0x1c4   : > { %v825_v16 = vadd.f32 %v3155_v15, %v3652_v14  ;;  %v816_v17 = vpop.f32.mrb[1].mxu1 }
 0x1c5   : > { %v817_v18 = vadd.f32 %v3652_v14, %v816_v17  ;;  %v3156_v19 = vpop.f32.mrb[2].mxu1 }
 0x1c6   : > { %v828_v20 = vadd.f32 %v3156_v19, %v3652_v14  ;;  %v819_v21 = vpop.f32.mrb[3].mxu1  ;;  %v945_v23 = vmax.f32 %v825_v16, 0.0 }
 0x1c7   : > { %v820_v22 = vadd.f32 %v3652_v14, %v819_v21  ;;  %v943_v26 = vmax.f32 %v817_v18, 0.0 }
 0x1c8   : > { %v946_v24 = vmax.f32 %v828_v20, 0.0 }
 0x1c9   : > { %v944_v27 = vmax.f32 %v820_v22, 0.0 }
 0x1ca   : > { %v983_v28 = vpack.c.bf16 %v946_v24, %v945_v23 }
 0x1cb   : > { %v982_v29 = vpack.c.bf16 %v944_v27, %v943_v26  ;;  %v3159_v30 = vpop.f32.mrb[4].mxu1 }
 0x1cc   : > { %v841_v31 = vadd.f32 %v3159_v30, %v3652_v14  ;;  %v832_v32 = vpop.f32.mrb[5].mxu1 }
 0x1cd   : > { %v833_v33 = vadd.f32 %v3652_v14, %v832_v32  ;;  %v3160_v34 = vpop.f32.mrb[6].mxu1  ;;  %3191 = vmatprep.mubr.msk.bf16.mxu0 %vm1020_vm2, %v982_v29 }
 0x1ce   : > { %v844_v35 = vadd.f32 %v3160_v34, %v3652_v14  ;;  %v835_v36 = vpop.f32.mrb[7].mxu1  ;;  %3192 = vmatmul.mubr.msk.bf16.vlgmr.msra.gmra.mrb[32].mxu0 %vm1020_vm2, %v983_v28  ;;  %v949_v38 = vmax.f32 %v841_v31, 0.0 }
 0x1cf   : > { %v836_v37 = vadd.f32 %v3652_v14, %v835_v36  ;;  %v947_v40 = vmax.f32 %v833_v33, 0.0 }
 0x1d0   : > { %v950_v39 = vmax.f32 %v844_v35, 0.0 }
 0x1d1   : > { %v948_v41 = vmax.f32 %v836_v37, 0.0 }
 0x1d2   : > { %v985_v42 = vpack.c.bf16 %v950_v39, %v949_v38 }
 0x1d3   : > { %v984_v43 = vpack.c.bf16 %v948_v41, %v947_v40  ;;  %v3163_v44 = vpop.f32.mrb[8].mxu1 }
 0x1d4   : > { %v857_v45 = vadd.f32 %v3163_v44, %v3652_v14  ;;  %v848_v46 = vpop.f32.mrb[9].mxu1 }
 0x1d5   : > { %v849_v47 = vadd.f32 %v3652_v14, %v848_v46  ;;  %v3164_v48 = vpop.f32.mrb[10].mxu1  ;;  %3195 = vmatprep.mubr.msk.bf16.mxu0 %vm1020_vm2, %v984_v43 }
 0x1d6   : > { %v860_v49 = vadd.f32 %v3164_v48, %v3652_v14  ;;  %v851_v50 = vpop.f32.mrb[11].mxu1  ;;  %3196 = vmatmul.mubr.msk.bf16.gmra.mrb[36].mxu0 %vm1020_vm2, %v985_v42  ;;  %v953_v52 = vmax.f32 %v857_v45, 0.0 }
 0x1d7   : > { %v852_v51 = vadd.f32 %v3652_v14, %v851_v50  ;;  %v951_v54 = vmax.f32 %v849_v47, 0.0 }
 0x1d8   : > { %v954_v53 = vmax.f32 %v860_v49, 0.0 }
 0x1d9   : > { %v952_v55 = vmax.f32 %v852_v51, 0.0 }
 0x1da   : > { %v987_v56 = vpack.c.bf16 %v954_v53, %v953_v52 }
 0x1db   : > { %v986_v57 = vpack.c.bf16 %v952_v55, %v951_v54  ;;  %v3167_v58 = vpop.f32.mrb[12].mxu1 }
 0x1dc   : > { %v873_v59 = vadd.f32 %v3167_v58, %v3652_v14  ;;  %v864_v60 = vpop.f32.mrb[13].mxu1 }
 0x1dd   : > { %v865_v61 = vadd.f32 %v3652_v14, %v864_v60  ;;  %v3168_v62 = vpop.f32.mrb[14].mxu1  ;;  %3199 = vmatprep.mubr.msk.bf16.mxu0 %vm1020_vm2, %v986_v57 }
 0x1de   : > { %v876_v63 = vadd.f32 %v3168_v62, %v3652_v14  ;;  %v867_v0 = vpop.f32.mrb[15].mxu1  ;;  %3200 = vmatmul.mubr.msk.bf16.gmra.mrb[40].mxu0 %vm1020_vm2, %v987_v56  ;;  %v957_v2 = vmax.f32 %v873_v59, 0.0 }
 0x1df   : > { %v868_v1 = vadd.f32 %v3652_v14, %v867_v0  ;;  %v955_v4 = vmax.f32 %v865_v61, 0.0 }
 0x1e0   : > { %v958_v3 = vmax.f32 %v876_v63, 0.0 }
 0x1e1   : > { %v956_v5 = vmax.f32 %v868_v1, 0.0  ;;  %v3378_v1 = vld [vmem:[%s3639_s24 + $0x28] sm:$0xff]  }
 0x1e2   : > { %v989_v6 = vpack.c.bf16 %v958_v3, %v957_v2  ;;  %v3379_v2 = vld [vmem:[%s3639_s24 + $0x20] sm:$0xff]   ;;  %1673 = vrot.lane.b32.xlu1 %v3378_v1, %s3471_s25  ;;  %v3381_v3 = vld [vmem:[%s3639_s24 + $0x30] sm:$0xff]  }
 0x1e3   : > { %v988_v7 = vpack.c.bf16 %v956_v5, %v955_v4  ;;  %v3171_v8 = vpop.f32.mrb[16].mxu1  ;;  %1671 = vrot.lane.b32.xlu0 %v3379_v2, %s3471_s25  ;;  %v3382_v4 = vld [vmem:[%s3639_s24 + $0x48] sm:$0xff]   ;;  %v3383_v5 = vld [vmem:[%s3639_s24 + $0x40] sm:$0xff]  }
 0x1e4   : > { %v889_v9 = vadd.f32 %v3171_v8, %v3652_v14  ;;  %v880_v10 = vpop.f32.mrb[17].mxu1  ;;  %v3390_v8 = vld [vmem:[%s4422_s3 + $0x48] sm:$0xff]  }
 0x1e5   : > { %v881_v11 = vadd.f32 %v3652_v14, %v880_v10  ;;  %v3172_v25 = vpop.f32.mrb[18].mxu1  ;;  %3203 = vmatprep.mubr.msk.bf16.mxu0 %vm1020_vm2, %v988_v7  ;;  %v3385_v7 = vld [vmem:[%s3639_s24 + $0x50] sm:$0xff]   ;;  %3223 = vmatprep.subr.bf16.mxu1 %v3390_v8 }
 0x1e6   : > { %v892_v12 = vadd.f32 %v3172_v25, %v3652_v14  ;;  %v883_v13 = vpop.f32.mrb[19].mxu1  ;;  %3204 = vmatmul.mubr.msk.bf16.gmra.mrb[44].mxu0 %vm1020_vm2, %v989_v6  ;;  %v961_v16 = vmax.f32 %v889_v9, 0.0  ;;  %v3384_v6 = vld [vmem:[%s3639_s24 + $0x58] sm:$0xff]   ;;  %3224 = vmatpush3.bf16.msra.mxu1 %v3390_v8  ;;  %v3391_v9 = vld [vmem:[%s4422_s3 + $0x50] ss:$0 sps:$4 sm:$0xff]  }
 0x1e7   : > { %v884_v15 = vadd.f32 %v3652_v14, %v883_v13  ;;  %v959_v18 = vmax.f32 %v881_v11, 0.0  ;;  %1675 = vrot.lane.b32.xlu0 %v3381_v3, %s3471_s25  ;;  %3337 = vmatprep.subr.msk.bf16.mxu1 %vm1810_vm3, %v3391_v9  ;;  %v1812_v10 = vsel %vm1810_vm3, %v3391_v9, 0  ;;  %v3727_v11 = vld [vmem:[%s4423_s4 + $0x2] ss:$0 sm:$0xff] }
 0x1e8   : > { %v962_v17 = vmax.f32 %v892_v12, 0.0 }
 0x1e9   : > { %v960_v19 = vmax.f32 %v884_v15, 0.0 }
 0x1ea   : > { %v991_v20 = vpack.c.bf16 %v962_v17, %v961_v16  ;;  %3226 = vmatpush3.bf16.msra.mxu1 %v1812_v10 }
 0x1eb   : > { %v990_v21 = vpack.c.bf16 %v960_v19, %v959_v18  ;;  %v3175_v22 = vpop.f32.mrb[20].mxu1  ;;  %1679 = vrot.lane.b32.xlu0 %v3383_v5, %s3471_s25 }
 0x1ec   : > { %v905_v23 = vadd.f32 %v3175_v22, %v3652_v14  ;;  %v896_v24 = vpop.f32.mrb[21].mxu1 }
 0x1ed   : > { %v897_v26 = vadd.f32 %v3652_v14, %v896_v24  ;;  %v3176_v27 = vpop.f32.mrb[22].mxu1  ;;  %3207 = vmatprep.mubr.msk.bf16.mxu0 %vm1020_vm2, %v990_v21 }
 0x1ee   : > { %v908_v28 = vadd.f32 %v3176_v27, %v3652_v14  ;;  %v899_v29 = vpop.f32.mrb[23].mxu1  ;;  %3208 = vmatmul.mubr.msk.bf16.gmra.mrb[48].mxu0 %vm1020_vm2, %v991_v20  ;;  %v965_v31 = vmax.f32 %v905_v23, 0.0 }
 0x1ef   : > { %v900_v30 = vadd.f32 %v3652_v14, %v899_v29  ;;  %v963_v33 = vmax.f32 %v897_v26, 0.0  ;;  %1683 = vrot.lane.b32.xlu0 %v3385_v7, %s3471_s25 }
 0x1f0   : > { %v966_v32 = vmax.f32 %v908_v28, 0.0 }
 0x1f1   : > { %v964_v34 = vmax.f32 %v900_v30, 0.0 }
 0x1f2   : > { %v993_v35 = vpack.c.bf16 %v966_v32, %v965_v31 }
 0x1f3   : > { %v992_v36 = vpack.c.bf16 %v964_v34, %v963_v33  ;;  %v3179_v37 = vpop.f32.mrb[24].mxu1 }
 0x1f4   : > { %v921_v38 = vadd.f32 %v3179_v37, %v3652_v14  ;;  %v912_v39 = vpop.f32.mrb[25].mxu1 }
 0x1f5   : > { %v913_v40 = vadd.f32 %v3652_v14, %v912_v39  ;;  %v3180_v41 = vpop.f32.mrb[26].mxu1  ;;  %3211 = vmatprep.mubr.msk.bf16.mxu0 %vm1020_vm2, %v992_v36 }
 0x1f6   : > { %v924_v42 = vadd.f32 %v3180_v41, %v3652_v14  ;;  %v915_v43 = vpop.f32.mrb[27].mxu1  ;;  %3212 = vmatmul.mubr.msk.bf16.gmra.mrb[52].mxu0 %vm1020_vm2, %v993_v35  ;;  %v969_v45 = vmax.f32 %v921_v38, 0.0 }
 0x1f7   : > { %v916_v44 = vadd.f32 %v3652_v14, %v915_v43  ;;  %v967_v47 = vmax.f32 %v913_v40, 0.0 }
 0x1f8   : > { %v970_v46 = vmax.f32 %v924_v42, 0.0 }
 0x1f9   : > { %v968_v48 = vmax.f32 %v916_v44, 0.0 }
 0x1fa   : > { %v995_v49 = vpack.c.bf16 %v970_v46, %v969_v45 }
 0x1fb   : > { %v994_v50 = vpack.c.bf16 %v968_v48, %v967_v47  ;;  %v3183_v51 = vpop.f32.mrb[28].mxu1 }
 0x1fc   : > { %v937_v52 = vadd.f32 %v3183_v51, %v3652_v14  ;;  %v928_v53 = vpop.f32.mrb[29].mxu1 }
 0x1fd   : > { %v929_v54 = vadd.f32 %v3652_v14, %v928_v53  ;;  %v3184_v55 = vpop.f32.mrb[30].mxu1  ;;  %3215 = vmatprep.mubr.msk.bf16.mxu0 %vm1020_vm2, %v994_v50 }
 0x1fe   : > { %v940_v56 = vadd.f32 %v3184_v55, %v3652_v14  ;;  %v931_v57 = vpop.f32.mrb[31].mxu1  ;;  %3216 = vmatmul.mubr.msk.bf16.gmra.mrb[56].mxu0 %vm1020_vm2, %v995_v49  ;;  %v973_v59 = vmax.f32 %v937_v52, 0.0 }
 0x1ff   : > { %v932_v58 = vadd.f32 %v3652_v14, %v931_v57  ;;  %v971_v61 = vmax.f32 %v929_v54, 0.0  ;;  %v3380_v14 = vld [vmem:[%s3639_s24 + $0x38] sm:$0xff]  }
 0x200   : > { %v974_v60 = vmax.f32 %v940_v56, 0.0  ;;  %1677 = vrot.lane.b32.xlu1 %v3380_v14, %s3471_s25 }
 0x201   : > { %v972_v62 = vmax.f32 %v932_v58, 0.0 }
 0x202   : > { %v997_v63 = vpack.c.bf16 %v974_v60, %v973_v59 }
 0x203   : > { %v996_v0 = vpack.c.bf16 %v972_v62, %v971_v61 }
 0x204   : > { %1681 = vrot.lane.b32.xlu1 %v3382_v4, %s3471_s25 }
 0x205   : > { %3219 = vmatprep.mubr.msk.bf16.mxu0 %vm1020_vm2, %v996_v0 }
 0x206   : > { %3220 = vmatmul.mubr.msk.bf16.gmra.mrb[60].mxu0 %vm1020_vm2, %v997_v63 }
 0x208   : > { %1685 = vrot.lane.b32.xlu1 %v3384_v6, %s3471_s25 }
 0x2a1   : > { %v3193_v25 = vpop.f32.mrb[32].mxu0 }
 0x2a2   : > { %v3730_v12 = vadd.f32 %v3193_v25, %v3727_v11  ;;  %v1103_v13 = vpop.f32.mrb[33].mxu0 }
 0x2a3   : > { %v3733_v15 = vadd.f32 %v3727_v11, %v1103_v13  ;;  %v3194_v16 = vpop.f32.mrb[34].mxu0 }
 0x2a4   : > { %v1232_v17 = vmul.f32 0.5, %v3730_v12  ;;  %v3737_v18 = vadd.f32 %v3194_v16, %v3727_v11  ;;  %v1106_v19 = vpop.f32.mrb[35].mxu0 }
 0x2a5   : > { %v1230_v20 = vmul.f32 0.5, %v3733_v15  ;;  %v3741_v21 = vadd.f32 %v3727_v11, %v1106_v19 }
 0x2a6   : > { %v1266_v22 = vmul.f32 1.442695, %v1232_v17  ;;  %v1233_v23 = vmul.f32 0.5, %v3737_v18 }
 0x2a7   : > { %v1262_v24 = vmul.f32 1.442695, %v1230_v20  ;;  %v1231_v26 = vmul.f32 0.5, %v3741_v21 }
 0x2a8   : > { %3399 = vpow2.f32 %v1266_v22  ;;  %v1268_v27 = vmul.f32 1.442695, %v1233_v23 }
 0x2a9   : > { %3401 = vpow2.f32 %v1262_v24  ;;  %v1264_v28 = vmul.f32 1.442695, %v1231_v26  ;;  %v3197_v29 = vpop.f32.mrb[36].mxu0 }
 0x2aa   : > { %v3746_v30 = vadd.f32 %v3197_v29, %v3727_v11  ;;  %v1119_v31 = vpop.f32.mrb[37].mxu0  ;;  %3403 = vpow2.f32 %v1268_v27 }
 0x2ab   : > { %v3749_v32 = vadd.f32 %v3727_v11, %v1119_v31  ;;  %v3198_v33 = vpop.f32.mrb[38].mxu0  ;;  %3405 = vpow2.f32 %v1264_v28 }
 0x2ac   : > { %v1236_v34 = vmul.f32 0.5, %v3746_v30  ;;  %v3753_v35 = vadd.f32 %v3198_v33, %v3727_v11  ;;  %v1122_v36 = vpop.f32.mrb[39].mxu0 }
 0x2ad   : > { %v1234_v37 = vmul.f32 0.5, %v3749_v32  ;;  %v3757_v38 = vadd.f32 %v3727_v11, %v1122_v36 }
 0x2ae   : > { %v1274_v39 = vmul.f32 1.442695, %v1236_v34  ;;  %v1237_v40 = vmul.f32 0.5, %v3753_v35 }
 0x2af   : > { %v1270_v41 = vmul.f32 1.442695, %v1234_v37  ;;  %v1235_v42 = vmul.f32 0.5, %v3757_v38 }
 0x2b0   : > { %3407 = vpow2.f32 %v1274_v39  ;;  %v1276_v43 = vmul.f32 1.442695, %v1237_v40 }
 0x2b1   : > { %3409 = vpow2.f32 %v1270_v41  ;;  %v1272_v44 = vmul.f32 1.442695, %v1235_v42  ;;  %v3201_v45 = vpop.f32.mrb[40].mxu0 }
 0x2b2   : > { %v3400_v46 = vpop.eup %3399  ;;  %v3762_v47 = vadd.f32 %v3201_v45, %v3727_v11  ;;  %v1135_v48 = vpop.f32.mrb[41].mxu0  ;;  %3411 = vpow2.f32 %v1276_v43 }
 0x2b3   : > { %v3402_v49 = vpop.eup %3401  ;;  %v3765_v50 = vadd.f32 %v3727_v11, %v1135_v48  ;;  %1362 = vrot.lane.b32.xlu1 %v3400_v46, %s3472_s9  ;;  %v3202_v51 = vpop.f32.mrb[42].mxu0  ;;  %3413 = vpow2.f32 %v1272_v44 }
 0x2b4   : > { %v1240_v52 = vmul.f32 0.5, %v3762_v47  ;;  %v3770_v53 = vadd.f32 %v3202_v51, %v3727_v11  ;;  %v1138_v54 = vpop.f32.mrb[43].mxu0  ;;  %1358 = vrot.lane.b32.xlu0 %v3402_v49, %s3472_s9  ;;  %v3404_v57 = vpop.eup %3403 }
 0x2b5   : > { %v1238_v55 = vmul.f32 0.5, %v3765_v50  ;;  %v3775_v56 = vadd.f32 %v3727_v11, %v1138_v54  ;;  %v3406_v60 = vpop.eup %3405 }
 0x2b6   : > { %v1282_v58 = vmul.f32 1.442695, %v1240_v52  ;;  %v1241_v59 = vmul.f32 0.5, %v3770_v53 }
 0x2b7   : > { %v1278_v61 = vmul.f32 1.442695, %v1238_v55  ;;  %v1239_v62 = vmul.f32 0.5, %v3775_v56  ;;  %1364 = vrot.lane.b32.xlu1 %v3404_v57, %s3472_s9 }
 0x2b8   : > { %3415 = vpow2.f32 %v1282_v58  ;;  %v1284_v63 = vmul.f32 1.442695, %v1241_v59  ;;  %1360 = vrot.lane.b32.xlu0 %v3406_v60, %s3472_s9 }
 0x2b9   : > { %3417 = vpow2.f32 %v1278_v61  ;;  %v1280_v0 = vmul.f32 1.442695, %v1239_v62  ;;  %v3205_v1 = vpop.f32.mrb[44].mxu0 }
 0x2ba   : > { %v3408_v2 = vpop.eup %3407  ;;  %v3782_v14 = vadd.f32 %v3205_v1, %v3727_v11  ;;  %v1151_v3 = vpop.f32.mrb[45].mxu0  ;;  %3419 = vpow2.f32 %v1284_v63 }
 0x2bb   : > { %v3410_v4 = vpop.eup %3409  ;;  %v3785_v5 = vadd.f32 %v3727_v11, %v1151_v3  ;;  %v3206_v6 = vpop.f32.mrb[46].mxu0  ;;  %3421 = vpow2.f32 %v1280_v0 }
 0x2bc   : > { %v1244_v7 = vmul.f32 0.5, %v3782_v14  ;;  %v3789_v8 = vadd.f32 %v3206_v6, %v3727_v11  ;;  %v1154_v9 = vpop.f32.mrb[47].mxu0  ;;  %1366 = vrot.lane.b32.xlu1 %v3410_v4, %s3472_s9  ;;  %1370 = vrot.lane.b32.xlu0 %v3408_v2, %s3472_s9  ;;  %v3412_v13 = vpop.eup %3411 }
 0x2bd   : > { %v1242_v10 = vmul.f32 0.5, %v3785_v5  ;;  %v3795_v25 = vadd.f32 %v3727_v11, %v1154_v9  ;;  %v3414_v19 = vpop.eup %3413 }
 0x2be   : > { %v1290_v16 = vmul.f32 1.442695, %v1244_v7  ;;  %v1245_v17 = vmul.f32 0.5, %v3789_v8 }
 0x2bf   : > { %v1286_v20 = vmul.f32 1.442695, %v1242_v10  ;;  %v1243_v22 = vmul.f32 0.5, %v3795_v25 }
 0x2c0   : > { %3423 = vpow2.f32 %v1290_v16  ;;  %v1292_v23 = vmul.f32 1.442695, %v1245_v17  ;;  %1372 = vrot.lane.b32.xlu1 %v3412_v13, %s3472_s9  ;;  %1368 = vrot.lane.b32.xlu0 %v3414_v19, %s3472_s9 }
 0x2c1   : > { %3425 = vpow2.f32 %v1286_v20  ;;  %v1288_v24 = vmul.f32 1.442695, %v1243_v22  ;;  %v3209_v26 = vpop.f32.mrb[48].mxu0 }
 0x2c2   : > { %v3416_v27 = vpop.eup %3415  ;;  %v3802_v28 = vadd.f32 %v3209_v26, %v3727_v11  ;;  %v1167_v29 = vpop.f32.mrb[49].mxu0  ;;  %3427 = vpow2.f32 %v1292_v23 }
 0x2c3   : > { %v3418_v31 = vpop.eup %3417  ;;  %v3805_v33 = vadd.f32 %v3727_v11, %v1167_v29  ;;  %v3210_v34 = vpop.f32.mrb[50].mxu0  ;;  %3429 = vpow2.f32 %v1288_v24 }
 0x2c4   : > { %v1248_v36 = vmul.f32 0.5, %v3802_v28  ;;  %v3809_v37 = vadd.f32 %v3210_v34, %v3727_v11  ;;  %v1170_v39 = vpop.f32.mrb[51].mxu0  ;;  %1374 = vrot.lane.b32.xlu1 %v3418_v31, %s3472_s9  ;;  %1378 = vrot.lane.b32.xlu0 %v3416_v27, %s3472_s9  ;;  %v3420_v42 = vpop.eup %3419 }
 0x2c5   : > { %v1246_v40 = vmul.f32 0.5, %v3805_v33  ;;  %v3815_v41 = vadd.f32 %v3727_v11, %v1170_v39  ;;  %v3422_v45 = vpop.eup %3421 }
 0x2c6   : > { %v1298_v43 = vmul.f32 1.442695, %v1248_v36  ;;  %v1249_v44 = vmul.f32 0.5, %v3809_v37 }
 0x2c7   : > { %v1294_v46 = vmul.f32 1.442695, %v1246_v40  ;;  %v1247_v48 = vmul.f32 0.5, %v3815_v41 }
 0x2c8   : > { %3431 = vpow2.f32 %v1298_v43  ;;  %v1300_v49 = vmul.f32 1.442695, %v1249_v44  ;;  %1380 = vrot.lane.b32.xlu1 %v3420_v42, %s3472_s9  ;;  %1376 = vrot.lane.b32.xlu0 %v3422_v45, %s3472_s9 }
 0x2c9   : > { %3433 = vpow2.f32 %v1294_v46  ;;  %v1296_v51 = vmul.f32 1.442695, %v1247_v48  ;;  %v3213_v52 = vpop.f32.mrb[52].mxu0 }
 0x2ca   : > { %v3424_v54 = vpop.eup %3423  ;;  %v3822_v55 = vadd.f32 %v3213_v52, %v3727_v11  ;;  %v1183_v57 = vpop.f32.mrb[53].mxu0  ;;  %3435 = vpow2.f32 %v1300_v49 }
 0x2cb   : > { %v3426_v58 = vpop.eup %3425  ;;  %v3825_v59 = vadd.f32 %v3727_v11, %v1183_v57  ;;  %v3214_v60 = vpop.f32.mrb[54].mxu0  ;;  %3437 = vpow2.f32 %v1296_v51 }
 0x2cc   : > { %v1252_v61 = vmul.f32 0.5, %v3822_v55  ;;  %v3829_v62 = vadd.f32 %v3214_v60, %v3727_v11  ;;  %v1186_v63 = vpop.f32.mrb[55].mxu0  ;;  %1382 = vrot.lane.b32.xlu1 %v3426_v58, %s3472_s9  ;;  %1386 = vrot.lane.b32.xlu0 %v3424_v54, %s3472_s9  ;;  %v3428_v2 = vpop.eup %3427 }
 0x2cd   : > { %v1250_v0 = vmul.f32 0.5, %v3825_v59  ;;  %v3835_v1 = vadd.f32 %v3727_v11, %v1186_v63  ;;  %v3430_v6 = vpop.eup %3429 }
 0x2ce   : > { %v1306_v3 = vmul.f32 1.442695, %v1252_v61  ;;  %v1253_v4 = vmul.f32 0.5, %v3829_v62 }
 0x2cf   : > { %v1302_v7 = vmul.f32 1.442695, %v1250_v0  ;;  %v1251_v9 = vmul.f32 0.5, %v3835_v1 }
 0x2d0   : > { %3439 = vpow2.f32 %v1306_v3  ;;  %v1308_v10 = vmul.f32 1.442695, %v1253_v4  ;;  %1388 = vrot.lane.b32.xlu1 %v3428_v2, %s3472_s9  ;;  %1384 = vrot.lane.b32.xlu0 %v3430_v6, %s3472_s9 }
 0x2d1   : > { %3441 = vpow2.f32 %v1302_v7  ;;  %v1304_v13 = vmul.f32 1.442695, %v1251_v9  ;;  %v3217_v16 = vpop.f32.mrb[56].mxu0 }
 0x2d2   : > { %v3432_v17 = vpop.eup %3431  ;;  %v3842_v19 = vadd.f32 %v3217_v16, %v3727_v11  ;;  %v1199_v20 = vpop.f32.mrb[57].mxu0  ;;  %3443 = vpow2.f32 %v1308_v10 }
 0x2d3   : > { %v3434_v22 = vpop.eup %3433  ;;  %v3845_v23 = vadd.f32 %v3727_v11, %v1199_v20  ;;  %v3218_v24 = vpop.f32.mrb[58].mxu0  ;;  %3445 = vpow2.f32 %v1304_v13 }
 0x2d4   : > { %v1256_v26 = vmul.f32 0.5, %v3842_v19  ;;  %v3849_v27 = vadd.f32 %v3218_v24, %v3727_v11  ;;  %v1202_v29 = vpop.f32.mrb[59].mxu0  ;;  %1390 = vrot.lane.b32.xlu1 %v3434_v22, %s3472_s9  ;;  %1394 = vrot.lane.b32.xlu0 %v3432_v17, %s3472_s9  ;;  %v3436_v36 = vpop.eup %3435  ;;  %v3386_v24 = vld [vmem:[%s3639_s24 + $0x68] sm:$0xff]  }
 0x2d5   : > { %v1254_v31 = vmul.f32 0.5, %v3845_v23  ;;  %v3855_v34 = vadd.f32 %v3727_v11, %v1202_v29  ;;  %v3438_v42 = vpop.eup %3437 }
 0x2d6   : > { %v1314_v39 = vmul.f32 1.442695, %v1256_v26  ;;  %v1257_v40 = vmul.f32 0.5, %v3849_v27  ;;  %v3387_v26 = vld [vmem:[%s3639_s24 + $0x60] sm:$0xff]  }
 0x2d7   : > { %v1310_v43 = vmul.f32 1.442695, %v1254_v31  ;;  %v1255_v44 = vmul.f32 0.5, %v3855_v34 }
 0x2d8   : > { %3447 = vpow2.f32 %v1314_v39  ;;  %v1316_v45 = vmul.f32 1.442695, %v1257_v40  ;;  %1396 = vrot.lane.b32.xlu1 %v3436_v36, %s3472_s9  ;;  %1392 = vrot.lane.b32.xlu0 %v3438_v42, %s3472_s9  ;;  %v3388_v40 = vld [vmem:[%s3639_s24 + $0x78] sm:$0xff]   ;;  %v3389_v42 = vld [vmem:[%s3639_s24 + $0x70] sm:$0xff]  }
 0x2d9   : > { %3449 = vpow2.f32 %v1310_v43  ;;  %v1312_v46 = vmul.f32 1.442695, %v1255_v44  ;;  %v3221_v48 = vpop.f32.mrb[60].mxu0  ;;  %v3905_v43 = vpop.permute.xlu1 %1665 }
 0x2da   : > { %v3440_v49 = vpop.eup %3439  ;;  %v3862_v51 = vadd.f32 %v3221_v48, %v3727_v11  ;;  %v1215_v52 = vpop.f32.mrb[61].mxu0  ;;  %3451 = vpow2.f32 %v1316_v45 }
 0x2db   : > { %v3442_v54 = vpop.eup %3441  ;;  %v3865_v57 = vadd.f32 %v3727_v11, %v1215_v52  ;;  %v3222_v58 = vpop.f32.mrb[62].mxu0  ;;  %3453 = vpow2.f32 %v1312_v46 }
 0x2dc   : > { %v3868_v60 = vadd.f32 %v3222_v58, %v3727_v11  ;;  %v1218_v61 = vpop.f32.mrb[63].mxu0  ;;  %1398 = vrot.lane.b32.xlu1 %v3442_v54, %s3472_s9  ;;  %1402 = vrot.lane.b32.xlu0 %v3440_v49, %s3472_s9  ;;  %v3444_v2 = vpop.eup %3443  ;;  %v1260_v6 = vmul.f32 0.5, %v3862_v51 }
 0x2dd   : > { %v1258_v63 = vmul.f32 0.5, %v3865_v57  ;;  %v3874_v0 = vadd.f32 %v3727_v11, %v1218_v61  ;;  %v3446_v3 = vpop.eup %3445  ;;  %v3907_v44 = vpop.permute.xlu0 %1663 }
 0x2de   : > { %v1261_v9 = vmul.f32 0.5, %v3868_v60  ;;  %v1322_v11 = vmul.f32 1.442695, %v1260_v6  ;;  %v3913_v45 = vpop.permute.xlu1 %1669  ;;  %v305_v6 = vld [vmem:[%s3967_s14] sm:$0xff] }
 0x2df   : > { %v1259_v4 = vmul.f32 0.5, %v3874_v0  ;;  %v1318_v7 = vmul.f32 1.442695, %v1258_v63 }
 0x2e0   : > { %1404 = vrot.lane.b32.xlu1 %v3444_v2, %s3472_s9  ;;  %1400 = vrot.lane.b32.xlu0 %v3446_v3, %s3472_s9  ;;  %v1324_v17 = vmul.f32 1.442695, %v1261_v9  ;;  %v307_v3 = vld [vmem:[%s3967_s14 + $0x10] sm:$0xff]  ;;  %v308_v9 = vld [vmem:[%s3967_s14 + $0x18] sm:$0xff] }
 0x2e1   : > { %v1320_v10 = vmul.f32 1.442695, %v1259_v4  ;;  %3455 = vpow2.f32 %v1318_v7  ;;  %v3919_v46 = vpop.permute.xlu0 %1667 }
 0x2e2   : > { %v3448_v13 = vpop.eup %3447  ;;  %v3925_v48 = vpop.permute.xlu1 %1673 }
 0x2e3   : > { %v3450_v16 = vpop.eup %3449  ;;  %3457 = vpow2.f32 %v1320_v10 }
 0x2e4   : > { %1406 = vrot.lane.b32.xlu1 %v3450_v16, %s3472_s9  ;;  %1410 = vrot.lane.b32.xlu0 %v3448_v13, %s3472_s9  ;;  %v3452_v20 = vpop.eup %3451  ;;  %3459 = vpow2.f32 %v1322_v11  ;;  %v306_v13 = vld [vmem:[%s3967_s14 + $0x8] sm:$0xff] }
 0x2e5   : > { %v3454_v22 = vpop.eup %3453  ;;  %3461 = vpow2.f32 %v1324_v17  ;;  %v3927_v49 = vpop.permute.xlu0 %1671 }
 0x2e6   : > { %v3933_v52 = vpop.permute.xlu1 %1677 }
 0x2e8   : > { %1412 = vrot.lane.b32.xlu1 %v3452_v20, %s3472_s9  ;;  %1408 = vrot.lane.b32.xlu0 %v3454_v22, %s3472_s9  ;;  %v3392_v22 = vld [vmem:[%s4422_s3 + $0x58] sm:$0xff]  }
 0x2e9   : > { %v3939_v54 = vpop.permute.xlu0 %1675  ;;  %3259 = vmatprep.subr.bf16.mxu0 %v3392_v22 }
 0x2ea   : > { %v3945_v58 = vpop.permute.xlu1 %1681  ;;  %3260 = vmatpush3.bf16.msra.mxu0 %v3392_v22  ;;  %v313_v22 = vld [vmem:[%s3967_s14 + $0x40] sm:$0xff] }
 0x2eb   : > { %v3456_v29 = vpop.eup %3455 }
 0x2ec   : > { %1689 = vrot.lane.b32.xlu1 %v3386_v24, %s3471_s25  ;;  %1687 = vrot.lane.b32.xlu0 %v3387_v26, %s3471_s25  ;;  %v3393_v26 = vld [vmem:[%s4422_s3 + $0x60] sm:$0xff]  }
 0x2ed   : > { %v3458_v31 = vpop.eup %3457  ;;  %v3947_v61 = vpop.permute.xlu0 %1679  ;;  %3261 = vmatprep.subr.bf16.mxu0 %v3393_v26 }
 0x2ee   : > { %v3460_v36 = vpop.eup %3459  ;;  %v3954_v63 = vpop.permute.xlu1 %1685  ;;  %3262 = vmatpush3.bf16.msra.mxu0 %v3393_v26  ;;  %v315_v26 = vld [vmem:[%s3967_s14 + $0x50] sm:$0xff] }
 0x2ef   : > { %v3462_v39 = vpop.eup %3461 }
 0x2f0   : > { %1414 = vrot.lane.b32.xlu1 %v3456_v29, %s3472_s9  ;;  %1416 = vrot.lane.b32.xlu0 %v3458_v31, %s3472_s9 }
 0x2f1   : > { %v3960_v2 = vpop.permute.xlu0 %1683 }
 0x2f4   : > { %1420 = vrot.lane.b32.xlu1 %v3462_v39, %s3472_s9  ;;  %1418 = vrot.lane.b32.xlu0 %v3460_v36, %s3472_s9 }
 0x2f8   : > { %1693 = vrot.lane.b32.xlu1 %v3388_v40, %s3471_s25  ;;  %1691 = vrot.lane.b32.xlu0 %v3389_v42, %s3471_s25  ;;  %v309_v42 = vld [vmem:[%s3967_s14 + $0x20] sm:$0xff] }
 0x2fc   : > { %2621 = vrot.lane.b32.xlu1 %v3741_v21, %s3473_s10  ;;  %2619 = vrot.lane.b32.xlu0 %v3733_v15, %s3473_s10 }
 0x300   : > { %2625 = vrot.lane.b32.xlu1 %v3737_v18, %s3473_s10  ;;  %2623 = vrot.lane.b32.xlu0 %v3730_v12, %s3473_s10 }
 0x304   : > { %2629 = vrot.lane.b32.xlu1 %v3757_v38, %s3473_s10  ;;  %2627 = vrot.lane.b32.xlu0 %v3749_v32, %s3473_s10 }
 0x308   : > { %2633 = vrot.lane.b32.xlu1 %v3753_v35, %s3473_s10  ;;  %2631 = vrot.lane.b32.xlu0 %v3746_v30, %s3473_s10 }
 0x30c   : > { %2637 = vrot.lane.b32.xlu1 %v3775_v56, %s3473_s10  ;;  %2635 = vrot.lane.b32.xlu0 %v3765_v50, %s3473_s10 }
 0x310   : > { %2641 = vrot.lane.b32.xlu1 %v3770_v53, %s3473_s10  ;;  %2639 = vrot.lane.b32.xlu0 %v3762_v47, %s3473_s10 }
 0x314   : > { %2645 = vrot.lane.b32.xlu1 %v3795_v25, %s3473_s10  ;;  %2643 = vrot.lane.b32.xlu0 %v3785_v5, %s3473_s10 }
 0x318   : > { %2649 = vrot.lane.b32.xlu1 %v3789_v8, %s3473_s10  ;;  %2647 = vrot.lane.b32.xlu0 %v3782_v14, %s3473_s10 }
 0x31c   : > { %2653 = vrot.lane.b32.xlu1 %v3815_v41, %s3473_s10  ;;  %2651 = vrot.lane.b32.xlu0 %v3805_v33, %s3473_s10 }
 0x320   : > { %2657 = vrot.lane.b32.xlu1 %v3809_v37, %s3473_s10  ;;  %2655 = vrot.lane.b32.xlu0 %v3802_v28, %s3473_s10 }
 0x324   : > { %2661 = vrot.lane.b32.xlu1 %v3835_v1, %s3473_s10  ;;  %2659 = vrot.lane.b32.xlu0 %v3825_v59, %s3473_s10 }
 0x325   : > { %v1363_v4 = vpop.permute.xlu1 %1362 }
 0x326   : > { %v1359_v7 = vpop.permute.xlu0 %1358  ;;  %v1456_v10 = vmul.f32 %v1363_v4, %v307_v3  ;;  %v311_v3 = vld [vmem:[%s3967_s14 + $0x30] sm:$0xff] }
 0x327   : > { %v1454_v16 = vmul.f32 %v1359_v7, %v305_v6  ;;  %v3394_v6 = vld [vmem:[%s4422_s3 + $0x68] sm:$0xff]  }
 0x328   : > { %2665 = vrot.lane.b32.xlu1 %v3829_v62, %s3473_s10  ;;  %2663 = vrot.lane.b32.xlu0 %v3822_v55, %s3473_s10  ;;  %v1488_v29 = vadd.f32 %v1456_v10, %v3730_v12 }
 0x329   : > { %v1365_v11 = vpop.permute.xlu1 %1364  ;;  %v1486_v36 = vadd.f32 %v1454_v16, %v3733_v15  ;;  %v312_v15 = vld [vmem:[%s3967_s14 + $0x38] sm:$0xff]  ;;  %3263 = vmatprep.subr.bf16.mxu0 %v3394_v6 }
 0x32a   : > { %v1457_v17 = vmul.f32 %v1365_v11, %v308_v9  ;;  %v1361_v20 = vpop.permute.xlu0 %1360  ;;  %3264 = vmatpush3.bf16.msra.mxu0 %v3394_v6 }
 0x32b   : > { %v1455_v24 = vmul.f32 %v1361_v20, %v306_v13 }
 0x32c   : > { %v1489_v31 = vadd.f32 %v1457_v17, %v3737_v18  ;;  %2669 = vrot.lane.b32.xlu1 %v3855_v34, %s3473_s10  ;;  %2667 = vrot.lane.b32.xlu0 %v3845_v23, %s3473_s10 }
 0x32d   : > { %v1487_v39 = vadd.f32 %v1455_v24, %v3741_v21  ;;  %v310_v21 = vld [vmem:[%s3967_s14 + $0x28] sm:$0xff] }
 0x32e   : > { %v1519_v40 = vpack.c.bf16 %v1489_v31, %v1488_v29  ;;  %v1367_v12 = vpop.permute.xlu1 %1366  ;;  %v1371_v18 = vpop.permute.xlu0 %1370 }
 0x32f   : > { %v1518_v4 = vpack.c.bf16 %v1487_v39, %v1486_v36  ;;  %v1458_v7 = vmul.f32 %v1367_v12, %v309_v42  ;;  %v1460_v9 = vmul.f32 %v1371_v18, %v311_v3 }
 0x330   : > { %1536 = vst.msk [vmem:[#allocation2 + $0x8] sm:$0xff] %vm1534_vm4, %v1519_v40  ;;  %2673 = vrot.lane.b32.xlu1 %v3849_v27, %s3473_s10  ;;  %2671 = vrot.lane.b32.xlu0 %v3842_v19, %s3473_s10 }
 0x331   : > { %1713 = vst.msk [vmem:[#allocation2 + $0x8] sm:$0xff] %vm1711_vm5, %v3905_v43  ;;  %v1490_v43 = vadd.f32 %v1458_v7, %v3749_v32  ;;  %v1492_v17 = vadd.f32 %v1460_v9, %v3746_v30  ;;  %v316_v32 = vld [vmem:[%s3967_s14 + $0x58] sm:$0xff]  ;;  %v314_v30 = vld [vmem:[%s3967_s14 + $0x48] sm:$0xff]  ;;  %v319_v7 = vld [vmem:[%s3967_s14 + $0x70] sm:$0xff] }
 0x332   : > { %1535 = vst.msk [vmem:[#allocation2] sm:$0xff] %vm1534_vm4, %v1518_v4  ;;  %v1373_v10 = vpop.permute.xlu1 %1372  ;;  %v1369_v13 = vpop.permute.xlu0 %1368 }
 0x333   : > { %1712 = vst.msk [vmem:[#allocation2] sm:$0xff] %vm1711_vm5, %v3907_v44  ;;  %v1461_v16 = vmul.f32 %v1373_v10, %v312_v15  ;;  %v1459_v11 = vmul.f32 %v1369_v13, %v310_v21 }
 0x334   : > { %2677 = vrot.lane.b32.xlu1 %v3874_v0, %s3473_s10  ;;  %2675 = vrot.lane.b32.xlu0 %v3865_v57, %s3473_s10 }
 0x335   : > { %v1493_v44 = vadd.f32 %v1461_v16, %v3753_v35  ;;  %v1491_v20 = vadd.f32 %v1459_v11, %v3757_v38  ;;  %v320_v16 = vld [vmem:[%s3967_s14 + $0x78] sm:$0xff]  ;;  %v318_v11 = vld [vmem:[%s3967_s14 + $0x68] sm:$0xff] }
 0x336   : > { %v1375_v24 = vpop.permute.xlu1 %1374  ;;  %v1379_v29 = vpop.permute.xlu0 %1378 }
 0x337   : > { %v1521_v31 = vpack.c.bf16 %v1493_v44, %v1492_v17  ;;  %v1520_v36 = vpack.c.bf16 %v1491_v20, %v1490_v43  ;;  %v1462_v35 = vmul.f32 %v1375_v24, %v313_v22  ;;  %v1464_v38 = vmul.f32 %v1379_v29, %v315_v26  ;;  %v321_v29 = vld [vmem:[%s3967_s14 + $0x80] sm:$0xff] }
 0x338   : > { %2681 = vrot.lane.b32.xlu1 %v3868_v60, %s3473_s10  ;;  %2679 = vrot.lane.b32.xlu0 %v3862_v51, %s3473_s10  ;;  %v1729_v12 = vld [vmem:[#allocation2 + $0x8] sm:$0xff] }
 0x339   : > { %1538 = vst.msk [vmem:[#allocation2 + $0x18] sm:$0xff] %vm1534_vm4, %v1521_v31  ;;  %1537 = vst.msk [vmem:[#allocation2 + $0x10] sm:$0xff] %vm1534_vm4, %v1520_v36  ;;  %v1494_v4 = vadd.f32 %v1462_v35, %v3765_v50  ;;  %v1496_v6 = vadd.f32 %v1464_v38, %v3762_v47  ;;  %v323_v31 = vld [vmem:[%s3967_s14 + $0x90] sm:$0xff]  ;;  %v324_v35 = vld [vmem:[%s3967_s14 + $0x98] sm:$0xff] }
 0x33a   : > { %v1728_v39 = vld [vmem:[#allocation2] sm:$0xff]  ;;  %1715 = vst.msk [vmem:[#allocation2 + $0x18] sm:$0xff] %vm1711_vm5, %v3913_v45  ;;  %1714 = vst.msk [vmem:[#allocation2 + $0x10] sm:$0xff] %vm1711_vm5, %v3919_v46  ;;  %v1381_v40 = vpop.permute.xlu1 %1380  ;;  %v1377_v42 = vpop.permute.xlu0 %1376  ;;  %v322_v38 = vld [vmem:[%s3967_s14 + $0x88] sm:$0xff] }
 0x33b   : > { %3227 = vmatprep.mubr.msk.bf16.mxu1 %vm1761_vm6, %v1728_v39  ;;  %v1465_v3 = vmul.f32 %v1381_v40, %v316_v32  ;;  %v1463_v18 = vmul.f32 %v1377_v42, %v314_v30  ;;  %v317_v46 = vld [vmem:[%s3967_s14 + $0x60] sm:$0xff] }
 0x33c   : > { %3228 = vmatmul.mubr.msk.bf16.vlgmr.msra.gmra.mrb[32].mxu1 %vm1761_vm6, %v1729_v12 }
 0x33d   : > { %v1497_v45 = vadd.f32 %v1465_v3, %v3770_v53  ;;  %v1495_v15 = vadd.f32 %v1463_v18, %v3775_v56 }
 0x33e   : > { %v1383_v21 = vpop.permute.xlu1 %1382  ;;  %v1387_v9 = vpop.permute.xlu0 %1386 }
 0x33f   : > { %v1523_v10 = vpack.c.bf16 %v1497_v45, %v1496_v6  ;;  %v1522_v13 = vpack.c.bf16 %v1495_v15, %v1494_v4  ;;  %v1466_v43 = vmul.f32 %v1383_v21, %v317_v46  ;;  %v1468_v50 = vmul.f32 %v1387_v9, %v319_v7  ;;  %v325_v6 = vld [vmem:[%s3967_s14 + $0xa0] sm:$0xff]  ;;  %v327_v45 = vld [vmem:[%s3967_s14 + $0xb0] sm:$0xff]  ;;  %v328_v7 = vld [vmem:[%s3967_s14 + $0xb8] sm:$0xff] }
 0x340   : > { %v326_v9 = vld [vmem:[%s3967_s14 + $0xa8] sm:$0xff] }
 0x341   : > { %1540 = vst.msk [vmem:[#allocation2 + $0x28] sm:$0xff] %vm1534_vm4, %v1523_v10  ;;  %1539 = vst.msk [vmem:[#allocation2 + $0x20] sm:$0xff] %vm1534_vm4, %v1522_v13  ;;  %v1730_v47 = vld [vmem:[#allocation2 + $0x10] sm:$0xff]  ;;  %v1731_v53 = vld [vmem:[#allocation2 + $0x18] sm:$0xff]  ;;  %v1498_v22 = vadd.f32 %v1466_v43, %v3785_v5  ;;  %v1500_v24 = vadd.f32 %v1468_v50, %v3782_v14 }
 0x342   : > { %1717 = vst.msk [vmem:[#allocation2 + $0x28] sm:$0xff] %vm1711_vm5, %v3925_v48  ;;  %1716 = vst.msk [vmem:[#allocation2 + $0x20] sm:$0xff] %vm1711_vm5, %v3927_v49  ;;  %v1389_v56 = vpop.permute.xlu1 %1388  ;;  %3231 = vmatprep.mubr.msk.bf16.mxu1 %vm1761_vm6, %v1730_v47  ;;  %v1385_v17 = vpop.permute.xlu0 %1384 }
 0x343   : > { %v1469_v44 = vmul.f32 %v1389_v56, %v320_v16  ;;  %v1467_v20 = vmul.f32 %v1385_v17, %v318_v11  ;;  %v331_v56 = vld [vmem:[%s3967_s14 + $0xd0] sm:$0xff] }
 0x344   : > { %3232 = vmatmul.mubr.msk.bf16.gmra.mrb[36].mxu1 %vm1761_vm6, %v1731_v53  ;;  %v329_v53 = vld [vmem:[%s3967_s14 + $0xc0] sm:$0xff] }
 0x345   : > { %v1501_v26 = vadd.f32 %v1469_v44, %v3789_v8  ;;  %v1499_v48 = vadd.f32 %v1467_v20, %v3795_v25 }
 0x346   : > { %v1391_v49 = vpop.permute.xlu1 %1390  ;;  %v1395_v36 = vpop.permute.xlu0 %1394 }
 0x347   : > { %v1525_v32 = vpack.c.bf16 %v1501_v26, %v1500_v24  ;;  %v1524_v30 = vpack.c.bf16 %v1499_v48, %v1498_v22  ;;  %v1470_v39 = vmul.f32 %v1391_v49, %v321_v29  ;;  %v1472_v5 = vmul.f32 %v1395_v36, %v323_v31  ;;  %v332_v22 = vld [vmem:[%s3967_s14 + $0xd8] sm:$0xff]  ;;  %v330_v24 = vld [vmem:[%s3967_s14 + $0xc8] sm:$0xff] }
 0x349   : > { %1542 = vst.msk [vmem:[#allocation2 + $0x38] sm:$0xff] %vm1534_vm4, %v1525_v32  ;;  %1541 = vst.msk [vmem:[#allocation2 + $0x30] sm:$0xff] %vm1534_vm4, %v1524_v30  ;;  %v1732_v14 = vld [vmem:[#allocation2 + $0x20] sm:$0xff]  ;;  %v1733_v8 = vld [vmem:[#allocation2 + $0x28] sm:$0xff]  ;;  %v1502_v3 = vadd.f32 %v1470_v39, %v3805_v33  ;;  %v1504_v18 = vadd.f32 %v1472_v5, %v3802_v28 }
 0x34a   : > { %1719 = vst.msk [vmem:[#allocation2 + $0x38] sm:$0xff] %vm1711_vm5, %v3933_v52  ;;  %1718 = vst.msk [vmem:[#allocation2 + $0x30] sm:$0xff] %vm1711_vm5, %v3939_v54  ;;  %v1397_v25 = vpop.permute.xlu1 %1396  ;;  %3235 = vmatprep.mubr.msk.bf16.mxu1 %vm1761_vm6, %v1732_v14  ;;  %v1393_v40 = vpop.permute.xlu0 %1392  ;;  %v333_v39 = vld [vmem:[%s3967_s14 + $0xe0] sm:$0xff]  ;;  %v334_v5 = vld [vmem:[%s3967_s14 + $0xe8] sm:$0xff] }
 0x34b   : > { %v1473_v42 = vmul.f32 %v1397_v25, %v324_v35  ;;  %v1471_v12 = vmul.f32 %v1393_v40, %v322_v38  ;;  %v336_v25 = vld [vmem:[%s3967_s14 + $0xf8] sm:$0xff]  ;;  %v335_v40 = vld [vmem:[%s3967_s14 + $0xf0] sm:$0xff] }
 0x34c   : > { %3236 = vmatmul.mubr.msk.bf16.gmra.mrb[40].mxu1 %vm1761_vm6, %v1733_v8 }
 0x34d   : > { %v1505_v4 = vadd.f32 %v1473_v42, %v3809_v37  ;;  %v1503_v52 = vadd.f32 %v1471_v12, %v3815_v41 }
 0x34e   : > { %v1399_v54 = vpop.permute.xlu1 %1398  ;;  %v1403_v15 = vpop.permute.xlu0 %1402 }
 0x34f   : > { %v1527_v46 = vpack.c.bf16 %v1505_v4, %v1504_v18  ;;  %v1526_v21 = vpack.c.bf16 %v1503_v52, %v1502_v3  ;;  %v1474_v10 = vmul.f32 %v1399_v54, %v325_v6  ;;  %v1476_v33 = vmul.f32 %v1403_v15, %v327_v45 }
 0x351   : > { %1544 = vst.msk [vmem:[#allocation2 + $0x48] sm:$0xff] %vm1534_vm4, %v1527_v46  ;;  %1543 = vst.msk [vmem:[#allocation2 + $0x40] sm:$0xff] %vm1534_vm4, %v1526_v21  ;;  %v1734_v28 = vld [vmem:[#allocation2 + $0x30] sm:$0xff]  ;;  %v1735_v37 = vld [vmem:[#allocation2 + $0x38] sm:$0xff]  ;;  %v1506_v43 = vadd.f32 %v1474_v10, %v3825_v59  ;;  %v1508_v50 = vadd.f32 %v1476_v33, %v3822_v55 }
 0x352   : > { %1721 = vst.msk [vmem:[#allocation2 + $0x48] sm:$0xff] %vm1711_vm5, %v3945_v58  ;;  %1720 = vst.msk [vmem:[#allocation2 + $0x40] sm:$0xff] %vm1711_vm5, %v3947_v61  ;;  %v1405_v41 = vpop.permute.xlu1 %1404  ;;  %3239 = vmatprep.mubr.msk.bf16.mxu1 %vm1761_vm6, %v1734_v28  ;;  %v1401_v13 = vpop.permute.xlu0 %1400  ;;  %v3397_v10 = vld [vmem:[%s4422_s3 + $0x80] sm:$0xff]   ;;  %v3398_v33 = vld [vmem:[%s4422_s3 + $0x88] sm:$0xff]  }
 0x353   : > { %v1477_v16 = vmul.f32 %v1405_v41, %v328_v7  ;;  %v1475_v11 = vmul.f32 %v1401_v13, %v326_v9  ;;  %v3396_v9 = vld [vmem:[%s4422_s3 + $0x78] sm:$0xff]   ;;  %v4141_v28 = vld [vmem:[%s4423_s4 + $0x3] ss:$0 sm:$0xff] }
 0x354   : > { %3240 = vmatmul.mubr.msk.bf16.gmra.mrb[44].mxu1 %vm1761_vm6, %v1735_v37 }
 0x355   : > { %v1509_v47 = vadd.f32 %v1477_v16, %v3829_v62  ;;  %v1507_v58 = vadd.f32 %v1475_v11, %v3835_v1 }
 0x356   : > { %v1407_v61 = vpop.permute.xlu1 %1406  ;;  %v1411_v17 = vpop.permute.xlu0 %1410 }
 0x357   : > { %v1529_v44 = vpack.c.bf16 %v1509_v47, %v1508_v50  ;;  %v1528_v20 = vpack.c.bf16 %v1507_v58, %v1506_v43  ;;  %v1478_v26 = vmul.f32 %v1407_v61, %v329_v53  ;;  %v1480_v59 = vmul.f32 %v1411_v17, %v331_v56 }
 0x359   : > { %1546 = vst.msk [vmem:[#allocation2 + $0x58] sm:$0xff] %vm1534_vm4, %v1529_v44  ;;  %1545 = vst.msk [vmem:[#allocation2 + $0x50] sm:$0xff] %vm1534_vm4, %v1528_v20  ;;  %v1736_v48 = vld [vmem:[#allocation2 + $0x40] sm:$0xff]  ;;  %v1737_v55 = vld [vmem:[#allocation2 + $0x48] sm:$0xff]  ;;  %v1510_v31 = vadd.f32 %v1478_v26, %v3845_v23  ;;  %v1512_v36 = vadd.f32 %v1480_v59, %v3842_v19 }
 0x35a   : > { %1723 = vst.msk [vmem:[#allocation2 + $0x58] sm:$0xff] %vm1711_vm5, %v3954_v63  ;;  %1722 = vst.msk [vmem:[#allocation2 + $0x50] sm:$0xff] %vm1711_vm5, %v3960_v2  ;;  %v1413_v62 = vpop.permute.xlu1 %1412  ;;  %3243 = vmatprep.mubr.msk.bf16.mxu1 %vm1761_vm6, %v1736_v48  ;;  %v1409_v1 = vpop.permute.xlu0 %1408 }
 0x35b   : > { %v1481_v29 = vmul.f32 %v1413_v62, %v332_v22  ;;  %v1479_v49 = vmul.f32 %v1409_v1, %v330_v24 }
 0x35c   : > { %3244 = vmatmul.mubr.msk.bf16.gmra.mrb[48].mxu1 %vm1761_vm6, %v1737_v55 }
 0x35d   : > { %v1513_v32 = vadd.f32 %v1481_v29, %v3849_v27  ;;  %v1511_v63 = vadd.f32 %v1479_v49, %v3855_v34 }
 0x35e   : > { %v1690_v30 = vpop.permute.xlu1 %1689  ;;  %v1688_v35 = vpop.permute.xlu0 %1687 }
 0x35f   : > { %v1531_v2 = vpack.c.bf16 %v1513_v32, %v1512_v36  ;;  %v1530_v38 = vpack.c.bf16 %v1511_v63, %v1510_v31 }
 0x361   : > { %1548 = vst.msk [vmem:[#allocation2 + $0x68] sm:$0xff] %vm1534_vm4, %v1531_v2  ;;  %1547 = vst.msk [vmem:[#allocation2 + $0x60] sm:$0xff] %vm1534_vm4, %v1530_v38  ;;  %v1738_v14 = vld [vmem:[#allocation2 + $0x50] sm:$0xff]  ;;  %v1739_v23 = vld [vmem:[#allocation2 + $0x58] sm:$0xff] }
 0x362   : > { %1725 = vst.msk [vmem:[#allocation2 + $0x68] sm:$0xff] %vm1711_vm5, %v1690_v30  ;;  %1724 = vst.msk [vmem:[#allocation2 + $0x60] sm:$0xff] %vm1711_vm5, %v1688_v35  ;;  %v1415_v19 = vpop.permute.xlu1 %1414  ;;  %3247 = vmatprep.mubr.msk.bf16.mxu1 %vm1761_vm6, %v1738_v14  ;;  %v1417_v27 = vpop.permute.xlu0 %1416 }
 0x363   : > { %v1482_v34 = vmul.f32 %v1415_v19, %v333_v39  ;;  %v1483_v8 = vmul.f32 %v1417_v27, %v334_v5 }
 0x364   : > { %3248 = vmatmul.mubr.msk.bf16.gmra.mrb[52].mxu1 %vm1761_vm6, %v1739_v23 }
 0x365   : > { %v1514_v42 = vadd.f32 %v1482_v34, %v3865_v57  ;;  %v1515_v12 = vadd.f32 %v1483_v8, %v3874_v0 }
 0x366   : > { %v1421_v3 = vpop.permute.xlu1 %1420  ;;  %v1419_v18 = vpop.permute.xlu0 %1418 }
 0x367   : > { %v1532_v4 = vpack.c.bf16 %v1515_v12, %v1514_v42  ;;  %v1485_v52 = vmul.f32 %v1421_v3, %v336_v25  ;;  %v1484_v6 = vmul.f32 %v1419_v18, %v335_v40 }
 0x369   : > { %1549 = vst.msk [vmem:[#allocation2 + $0x70] sm:$0xff] %vm1534_vm4, %v1532_v4  ;;  %v1517_v54 = vadd.f32 %v1485_v52, %v3868_v60  ;;  %v1516_v45 = vadd.f32 %v1484_v6, %v3862_v51  ;;  %v1740_v15 = vld [vmem:[#allocation2 + $0x60] sm:$0xff]  ;;  %v1741_v46 = vld [vmem:[#allocation2 + $0x68] sm:$0xff]  ;;  %v3395_v51 = vld [vmem:[%s4422_s3 + $0x70] sm:$0xff]  }
 0x36a   : > { %3251 = vmatprep.mubr.msk.bf16.mxu1 %vm1761_vm6, %v1740_v15  ;;  %v1692_v21 = vpop.permute.xlu0 %1691  ;;  %v1694_v57 = vpop.permute.xlu1 %1693  ;;  %3297 = vmatprep.subr.bf16.mxu1 %v3395_v51 }
 0x36b   : > { %v1533_v7 = vpack.c.bf16 %v1517_v54, %v1516_v45  ;;  %1726 = vst.msk [vmem:[#allocation2 + $0x70] sm:$0xff] %vm1711_vm5, %v1692_v21  ;;  %3298 = vmatpush3.bf16.msra.mxu1 %v3395_v51 }
 0x36c   : > { %3252 = vmatmul.mubr.msk.bf16.gmra.mrb[56].mxu1 %vm1761_vm6, %v1741_v46  ;;  %3299 = vmatprep.subr.bf16.mxu1 %v3396_v9 }
 0x36d   : > { %1550 = vst.msk [vmem:[#allocation2 + $0x78] sm:$0xff] %vm1534_vm4, %v1533_v7 }
 0x36e   : > { %1727 = vst.msk [vmem:[#allocation2 + $0x78] sm:$0xff] %vm1711_vm5, %v1694_v57 }
 0x36f   : > { %3300 = vmatpush3.bf16.msra.mxu1 %v3396_v9 }
 0x370   : > { %3301 = vmatprep.subr.bf16.mxu1 %v3397_v10 }
 0x372   : > { %v1742_v0 = vld [vmem:[#allocation2 + $0x70] sm:$0xff] }
 0x373   : > { %3255 = vmatprep.mubr.msk.bf16.mxu1 %vm1761_vm6, %v1742_v0  ;;  %3302 = vmatpush3.bf16.msra.mxu1 %v3397_v10 }
 0x374   : > { %3303 = vmatprep.subr.bf16.mxu1 %v3398_v33 }
 0x375   : > { %v1743_v60 = vld [vmem:[#allocation2 + $0x78] sm:$0xff] }
 0x376   : > { %3256 = vmatmul.mubr.msk.bf16.gmra.mrb[60].mxu1 %vm1761_vm6, %v1743_v60 }
 0x377   : > { %3304 = vmatpush3.bf16.msra.mxu1 %v3398_v33 }
 0x40f   : > { %v3229_v37 = vpop.f32.mrb[32].mxu1 }
 0x410   : > { %v1857_v41 = vadd.f32 %v3229_v37, %v4141_v28  ;;  %v1848_v13 = vpop.f32.mrb[33].mxu1 }
 0x411   : > { %v1849_v16 = vadd.f32 %v4141_v28, %v1848_v13  ;;  %v3230_v11 = vpop.f32.mrb[34].mxu1 }
 0x412   : > { %v1860_v43 = vadd.f32 %v3230_v11, %v4141_v28  ;;  %v1851_v50 = vpop.f32.mrb[35].mxu1  ;;  %v1977_v58 = vmax.f32 %v1857_v41, 0.0 }
 0x413   : > { %v1852_v47 = vadd.f32 %v4141_v28, %v1851_v50  ;;  %v1975_v61 = vmax.f32 %v1849_v16, 0.0 }
 0x414   : > { %v1978_v53 = vmax.f32 %v1860_v43, 0.0 }
 0x415   : > { %v1976_v56 = vmax.f32 %v1852_v47, 0.0 }
 0x416   : > { %v2015_v17 = vpack.c.bf16 %v1978_v53, %v1977_v58 }
 0x417   : > { %v2014_v44 = vpack.c.bf16 %v1976_v56, %v1975_v61  ;;  %v3233_v20 = vpop.f32.mrb[36].mxu1 }
 0x418   : > { %v1873_v22 = vadd.f32 %v3233_v20, %v4141_v28  ;;  %v1864_v24 = vpop.f32.mrb[37].mxu1 }
 0x419   : > { %v1865_v26 = vadd.f32 %v4141_v28, %v1864_v24  ;;  %v3234_v59 = vpop.f32.mrb[38].mxu1  ;;  %3265 = vmatprep.mubr.msk.bf16.mxu0 %vm1020_vm2, %v2014_v44 }
 0x41a   : > { %v1876_v48 = vadd.f32 %v3234_v59, %v4141_v28  ;;  %v1867_v55 = vpop.f32.mrb[39].mxu1  ;;  %3266 = vmatmul.mubr.msk.bf16.vlgmr.msra.gmra.mrb[64].mxu0 %vm1020_vm2, %v2015_v17  ;;  %v1981_v1 = vmax.f32 %v1873_v22, 0.0 }
 0x41b   : > { %v1868_v62 = vadd.f32 %v4141_v28, %v1867_v55  ;;  %v1979_v49 = vmax.f32 %v1865_v26, 0.0 }
 0x41c   : > { %v1982_v29 = vmax.f32 %v1876_v48, 0.0 }
 0x41d   : > { %v1980_v31 = vmax.f32 %v1868_v62, 0.0 }
 0x41e   : > { %v2017_v36 = vpack.c.bf16 %v1982_v29, %v1981_v1 }
 0x41f   : > { %v2016_v32 = vpack.c.bf16 %v1980_v31, %v1979_v49  ;;  %v3237_v63 = vpop.f32.mrb[40].mxu1 }
 0x420   : > { %v1889_v30 = vadd.f32 %v3237_v63, %v4141_v28  ;;  %v1880_v35 = vpop.f32.mrb[41].mxu1 }
 0x421   : > { %v1881_v2 = vadd.f32 %v4141_v28, %v1880_v35  ;;  %v3238_v38 = vpop.f32.mrb[42].mxu1  ;;  %3269 = vmatprep.mubr.msk.bf16.mxu0 %vm1020_vm2, %v2016_v32 }
 0x422   : > { %v1892_v39 = vadd.f32 %v3238_v38, %v4141_v28  ;;  %v1883_v5 = vpop.f32.mrb[43].mxu1  ;;  %3270 = vmatmul.mubr.msk.bf16.gmra.mrb[68].mxu0 %vm1020_vm2, %v2017_v36  ;;  %v1985_v23 = vmax.f32 %v1889_v30, 0.0 }
 0x423   : > { %v1884_v14 = vadd.f32 %v4141_v28, %v1883_v5  ;;  %v1983_v27 = vmax.f32 %v1881_v2, 0.0 }
 0x424   : > { %v1986_v19 = vmax.f32 %v1892_v39, 0.0 }
 0x425   : > { %v1984_v34 = vmax.f32 %v1884_v14, 0.0 }
 0x426   : > { %v2019_v8 = vpack.c.bf16 %v1986_v19, %v1985_v23 }
 0x427   : > { %v2018_v25 = vpack.c.bf16 %v1984_v34, %v1983_v27  ;;  %v3241_v40 = vpop.f32.mrb[44].mxu1 }
 0x428   : > { %v1905_v42 = vadd.f32 %v3241_v40, %v4141_v28  ;;  %v1896_v12 = vpop.f32.mrb[45].mxu1 }
 0x429   : > { %v1897_v3 = vadd.f32 %v4141_v28, %v1896_v12  ;;  %v3242_v18 = vpop.f32.mrb[46].mxu1  ;;  %3273 = vmatprep.mubr.msk.bf16.mxu0 %vm1020_vm2, %v2018_v25 }
 0x42a   : > { %v1908_v4 = vadd.f32 %v3242_v18, %v4141_v28  ;;  %v1899_v52 = vpop.f32.mrb[47].mxu1  ;;  %3274 = vmatmul.mubr.msk.bf16.gmra.mrb[72].mxu0 %vm1020_vm2, %v2019_v8  ;;  %v1989_v54 = vmax.f32 %v1905_v42, 0.0 }
 0x42b   : > { %v1900_v6 = vadd.f32 %v4141_v28, %v1899_v52  ;;  %v1987_v15 = vmax.f32 %v1897_v3, 0.0 }
 0x42c   : > { %v1990_v45 = vmax.f32 %v1908_v4, 0.0 }
 0x42d   : > { %v1988_v46 = vmax.f32 %v1900_v6, 0.0  ;;  %v4194_v6 = vld [vmem:[%s4423_s4 + $0x4] ss:$0 sm:$0xff] }
 0x42e   : > { %v2021_v21 = vpack.c.bf16 %v1990_v45, %v1989_v54 }
 0x42f   : > { %v2020_v7 = vpack.c.bf16 %v1988_v46, %v1987_v15  ;;  %v3245_v57 = vpop.f32.mrb[48].mxu1 }
 0x430   : > { %v1921_v0 = vadd.f32 %v3245_v57, %v4141_v28  ;;  %v1912_v60 = vpop.f32.mrb[49].mxu1 }
 0x431   : > { %v1913_v51 = vadd.f32 %v4141_v28, %v1912_v60  ;;  %v3246_v9 = vpop.f32.mrb[50].mxu1  ;;  %3277 = vmatprep.mubr.msk.bf16.mxu0 %vm1020_vm2, %v2020_v7 }
 0x432   : > { %v1924_v10 = vadd.f32 %v3246_v9, %v4141_v28  ;;  %v1915_v33 = vpop.f32.mrb[51].mxu1  ;;  %3278 = vmatmul.mubr.msk.bf16.gmra.mrb[76].mxu0 %vm1020_vm2, %v2021_v21  ;;  %v1993_v41 = vmax.f32 %v1921_v0, 0.0 }
 0x433   : > { %v1916_v37 = vadd.f32 %v4141_v28, %v1915_v33  ;;  %v1991_v16 = vmax.f32 %v1913_v51, 0.0 }
 0x434   : > { %v1994_v13 = vmax.f32 %v1924_v10, 0.0 }
 0x435   : > { %v1992_v11 = vmax.f32 %v1916_v37, 0.0 }
 0x436   : > { %v2023_v43 = vpack.c.bf16 %v1994_v13, %v1993_v41 }
 0x437   : > { %v2022_v50 = vpack.c.bf16 %v1992_v11, %v1991_v16  ;;  %v3249_v47 = vpop.f32.mrb[52].mxu1 }
 0x438   : > { %v1937_v58 = vadd.f32 %v3249_v47, %v4141_v28  ;;  %v1928_v53 = vpop.f32.mrb[53].mxu1 }
 0x439   : > { %v1929_v61 = vadd.f32 %v4141_v28, %v1928_v53  ;;  %v3250_v56 = vpop.f32.mrb[54].mxu1  ;;  %3281 = vmatprep.mubr.msk.bf16.mxu0 %vm1020_vm2, %v2022_v50 }
 0x43a   : > { %v1940_v17 = vadd.f32 %v3250_v56, %v4141_v28  ;;  %v1931_v44 = vpop.f32.mrb[55].mxu1  ;;  %3282 = vmatmul.mubr.msk.bf16.gmra.mrb[80].mxu0 %vm1020_vm2, %v2023_v43  ;;  %v1997_v22 = vmax.f32 %v1937_v58, 0.0 }
 0x43b   : > { %v1932_v20 = vadd.f32 %v4141_v28, %v1931_v44  ;;  %v1995_v26 = vmax.f32 %v1929_v61, 0.0 }
 0x43c   : > { %v1998_v24 = vmax.f32 %v1940_v17, 0.0 }
 0x43d   : > { %v1996_v59 = vmax.f32 %v1932_v20, 0.0 }
 0x43e   : > { %v2025_v48 = vpack.c.bf16 %v1998_v24, %v1997_v22 }
 0x43f   : > { %v2024_v55 = vpack.c.bf16 %v1996_v59, %v1995_v26  ;;  %v3253_v62 = vpop.f32.mrb[56].mxu1 }
 0x440   : > { %v1953_v1 = vadd.f32 %v3253_v62, %v4141_v28  ;;  %v1944_v29 = vpop.f32.mrb[57].mxu1 }
 0x441   : > { %v1945_v49 = vadd.f32 %v4141_v28, %v1944_v29  ;;  %v3254_v31 = vpop.f32.mrb[58].mxu1  ;;  %3285 = vmatprep.mubr.msk.bf16.mxu0 %vm1020_vm2, %v2024_v55 }
 0x442   : > { %v1956_v36 = vadd.f32 %v3254_v31, %v4141_v28  ;;  %v1947_v32 = vpop.f32.mrb[59].mxu1  ;;  %3286 = vmatmul.mubr.msk.bf16.gmra.mrb[84].mxu0 %vm1020_vm2, %v2025_v48  ;;  %v2001_v30 = vmax.f32 %v1953_v1, 0.0 }
 0x443   : > { %v1948_v63 = vadd.f32 %v4141_v28, %v1947_v32  ;;  %v1999_v2 = vmax.f32 %v1945_v49, 0.0 }
 0x444   : > { %v2002_v35 = vmax.f32 %v1956_v36, 0.0 }
 0x445   : > { %v2000_v38 = vmax.f32 %v1948_v63, 0.0 }
 0x446   : > { %v2027_v39 = vpack.c.bf16 %v2002_v35, %v2001_v30 }
 0x447   : > { %v2026_v5 = vpack.c.bf16 %v2000_v38, %v1999_v2 }
 0x449   : > { %3289 = vmatprep.mubr.msk.bf16.mxu0 %vm1020_vm2, %v2026_v5  ;;  %v3257_v14 = vpop.f32.mrb[60].mxu1 }
 0x44a   : > { %3290 = vmatmul.mubr.msk.bf16.gmra.mrb[88].mxu0 %vm1020_vm2, %v2027_v39  ;;  %v1969_v23 = vadd.f32 %v3257_v14, %v4141_v28  ;;  %v1960_v19 = vpop.f32.mrb[61].mxu1 }
 0x44b   : > { %v1961_v27 = vadd.f32 %v4141_v28, %v1960_v19  ;;  %v3258_v34 = vpop.f32.mrb[62].mxu1 }
 0x44c   : > { %v1972_v8 = vadd.f32 %v3258_v34, %v4141_v28  ;;  %v1963_v25 = vpop.f32.mrb[63].mxu1  ;;  %v2005_v42 = vmax.f32 %v1969_v23, 0.0 }
 0x44d   : > { %v1964_v40 = vadd.f32 %v4141_v28, %v1963_v25  ;;  %v2003_v3 = vmax.f32 %v1961_v27, 0.0 }
 0x44e   : > { %v2006_v12 = vmax.f32 %v1972_v8, 0.0 }
 0x44f   : > { %v2004_v18 = vmax.f32 %v1964_v40, 0.0 }
 0x450   : > { %v2029_v4 = vpack.c.bf16 %v2006_v12, %v2005_v42 }
 0x451   : > { %v2028_v52 = vpack.c.bf16 %v2004_v18, %v2003_v3 }
 0x453   : > { %3293 = vmatprep.mubr.msk.bf16.mxu0 %vm1020_vm2, %v2028_v52 }
 0x454   : > { %3294 = vmatmul.mubr.msk.bf16.gmra.mrb[92].mxu0 %vm1020_vm2, %v2029_v4 }
 0x4ed   : > { %v3267_v54 = vpop.f32.mrb[64].mxu0 }
 0x4ee   : > { %v2143_v45 = vadd.f32 %v3267_v54, %v4194_v6  ;;  %v2134_v15 = vpop.f32.mrb[65].mxu0 }
 0x4ef   : > { %v2135_v28 = vadd.f32 %v4194_v6, %v2134_v15  ;;  %v3268_v46 = vpop.f32.mrb[66].mxu0 }
 0x4f0   : > { %v2146_v21 = vadd.f32 %v3268_v46, %v4194_v6  ;;  %v2137_v7 = vpop.f32.mrb[67].mxu0  ;;  %v2263_v0 = vmax.f32 %v2143_v45, 0.0 }
 0x4f1   : > { %v2138_v57 = vadd.f32 %v4194_v6, %v2137_v7  ;;  %v2261_v51 = vmax.f32 %v2135_v28, 0.0 }
 0x4f2   : > { %v2264_v60 = vmax.f32 %v2146_v21, 0.0 }
 0x4f3   : > { %v2262_v9 = vmax.f32 %v2138_v57, 0.0 }
 0x4f4   : > { %v2303_v10 = vpack.c.bf16 %v2264_v60, %v2263_v0 }
 0x4f5   : > { %v2302_v33 = vpack.c.bf16 %v2262_v9, %v2261_v51  ;;  %v3271_v37 = vpop.f32.mrb[68].mxu0 }
 0x4f6   : > { %v2159_v41 = vadd.f32 %v3271_v37, %v4194_v6  ;;  %v2150_v13 = vpop.f32.mrb[69].mxu0 }
 0x4f7   : > { %v2151_v16 = vadd.f32 %v4194_v6, %v2150_v13  ;;  %v3272_v11 = vpop.f32.mrb[70].mxu0  ;;  %3305 = vmatprep.mubr.msk.bf16.mxu1 %vm733_vm1, %v2302_v33 }
 0x4f8   : > { %v2162_v43 = vadd.f32 %v3272_v11, %v4194_v6  ;;  %v2153_v50 = vpop.f32.mrb[71].mxu0  ;;  %3306 = vmatmul.mubr.msk.bf16.vlgmr.msra.gmra.mrb[64].mxu1 %vm733_vm1, %v2303_v10  ;;  %v2267_v58 = vmax.f32 %v2159_v41, 0.0 }
 0x4f9   : > { %v2154_v47 = vadd.f32 %v4194_v6, %v2153_v50  ;;  %v2265_v61 = vmax.f32 %v2151_v16, 0.0 }
 0x4fa   : > { %v2268_v53 = vmax.f32 %v2162_v43, 0.0 }
 0x4fb   : > { %v2266_v56 = vmax.f32 %v2154_v47, 0.0 }
 0x4fc   : > { %v2305_v17 = vpack.c.bf16 %v2268_v53, %v2267_v58 }
 0x4fd   : > { %v2304_v44 = vpack.c.bf16 %v2266_v56, %v2265_v61  ;;  %v3275_v20 = vpop.f32.mrb[72].mxu0 }
 0x4fe   : > { %v2175_v22 = vadd.f32 %v3275_v20, %v4194_v6  ;;  %v2166_v24 = vpop.f32.mrb[73].mxu0 }
 0x4ff   : > { %v2167_v26 = vadd.f32 %v4194_v6, %v2166_v24  ;;  %v3276_v59 = vpop.f32.mrb[74].mxu0  ;;  %3309 = vmatprep.mubr.msk.bf16.mxu1 %vm733_vm1, %v2304_v44 }
 0x500   : > { %v2178_v48 = vadd.f32 %v3276_v59, %v4194_v6  ;;  %v2169_v55 = vpop.f32.mrb[75].mxu0  ;;  %3310 = vmatmul.mubr.msk.bf16.gmra.mrb[68].mxu1 %vm733_vm1, %v2305_v17  ;;  %v2271_v1 = vmax.f32 %v2175_v22, 0.0 }
 0x501   : > { %v2170_v62 = vadd.f32 %v4194_v6, %v2169_v55  ;;  %v2269_v49 = vmax.f32 %v2167_v26, 0.0 }
 0x502   : > { %v2272_v29 = vmax.f32 %v2178_v48, 0.0 }
 0x503   : > { %v2270_v31 = vmax.f32 %v2170_v62, 0.0 }
 0x504   : > { %v2307_v36 = vpack.c.bf16 %v2272_v29, %v2271_v1 }
 0x505   : > { %v2306_v32 = vpack.c.bf16 %v2270_v31, %v2269_v49  ;;  %v3279_v63 = vpop.f32.mrb[76].mxu0 }
 0x506   : > { %v2191_v30 = vadd.f32 %v3279_v63, %v4194_v6  ;;  %v2182_v35 = vpop.f32.mrb[77].mxu0 }
 0x507   : > { %v2183_v2 = vadd.f32 %v4194_v6, %v2182_v35  ;;  %v3280_v38 = vpop.f32.mrb[78].mxu0  ;;  %3313 = vmatprep.mubr.msk.bf16.mxu1 %vm733_vm1, %v2306_v32 }
 0x508   : > { %v2194_v39 = vadd.f32 %v3280_v38, %v4194_v6  ;;  %v2185_v5 = vpop.f32.mrb[79].mxu0  ;;  %3314 = vmatmul.mubr.msk.bf16.gmra.mrb[72].mxu1 %vm733_vm1, %v2307_v36  ;;  %v2275_v23 = vmax.f32 %v2191_v30, 0.0 }
 0x509   : > { %v2186_v14 = vadd.f32 %v4194_v6, %v2185_v5  ;;  %v2273_v27 = vmax.f32 %v2183_v2, 0.0 }
 0x50a   : > { %v2276_v19 = vmax.f32 %v2194_v39, 0.0 }
 0x50b   : > { %v2274_v34 = vmax.f32 %v2186_v14, 0.0  ;;  %v2620_v14 = vpop.permute.xlu0 %2619 }
 0x50c   : > { %v2309_v8 = vpack.c.bf16 %v2276_v19, %v2275_v23  ;;  %v2622_v23 = vpop.permute.xlu1 %2621 }
 0x50d   : > { %v2308_v25 = vpack.c.bf16 %v2274_v34, %v2273_v27  ;;  %v3283_v40 = vpop.f32.mrb[80].mxu0 }
 0x50e   : > { %v2207_v42 = vadd.f32 %v3283_v40, %v4194_v6  ;;  %v2198_v12 = vpop.f32.mrb[81].mxu0 }
 0x50f   : > { %v2199_v3 = vadd.f32 %v4194_v6, %v2198_v12  ;;  %v3284_v18 = vpop.f32.mrb[82].mxu0  ;;  %3317 = vmatprep.mubr.msk.bf16.mxu1 %vm733_vm1, %v2308_v25  ;;  %v2624_v19 = vpop.permute.xlu0 %2623  ;;  %v4247_v12 = vld [vmem:[%s4423_s4 + $0x5] ss:$0 sm:$0xff] }
 0x510   : > { %v2210_v4 = vadd.f32 %v3284_v18, %v4194_v6  ;;  %v2201_v52 = vpop.f32.mrb[83].mxu0  ;;  %3318 = vmatmul.mubr.msk.bf16.gmra.mrb[76].mxu1 %vm733_vm1, %v2309_v8  ;;  %v2279_v45 = vmax.f32 %v2207_v42, 0.0  ;;  %v2626_v27 = vpop.permute.xlu1 %2625 }
 0x511   : > { %v2202_v54 = vadd.f32 %v4194_v6, %v2201_v52  ;;  %v2277_v28 = vmax.f32 %v2199_v3, 0.0 }
 0x512   : > { %v2280_v15 = vmax.f32 %v2210_v4, 0.0 }
 0x513   : > { %v2278_v46 = vmax.f32 %v2202_v54, 0.0  ;;  %v2628_v34 = vpop.permute.xlu0 %2627 }
 0x514   : > { %v2311_v21 = vpack.c.bf16 %v2280_v15, %v2279_v45  ;;  %v2630_v8 = vpop.permute.xlu1 %2629 }
 0x515   : > { %v2310_v7 = vpack.c.bf16 %v2278_v46, %v2277_v28  ;;  %v3287_v57 = vpop.f32.mrb[84].mxu0 }
 0x516   : > { %v2223_v0 = vadd.f32 %v3287_v57, %v4194_v6  ;;  %v2214_v60 = vpop.f32.mrb[85].mxu0 }
 0x517   : > { %v2215_v51 = vadd.f32 %v4194_v6, %v2214_v60  ;;  %v3288_v9 = vpop.f32.mrb[86].mxu0  ;;  %3321 = vmatprep.mubr.msk.bf16.mxu1 %vm733_vm1, %v2310_v7  ;;  %v2632_v25 = vpop.permute.xlu0 %2631 }
 0x518   : > { %v2226_v10 = vadd.f32 %v3288_v9, %v4194_v6  ;;  %v2217_v33 = vpop.f32.mrb[87].mxu0  ;;  %3322 = vmatmul.mubr.msk.bf16.gmra.mrb[80].mxu1 %vm733_vm1, %v2311_v21  ;;  %v2283_v41 = vmax.f32 %v2223_v0, 0.0  ;;  %v2634_v40 = vpop.permute.xlu1 %2633 }
 0x519   : > { %v2218_v37 = vadd.f32 %v4194_v6, %v2217_v33  ;;  %v2281_v16 = vmax.f32 %v2215_v51, 0.0 }
 0x51a   : > { %v2284_v13 = vmax.f32 %v2226_v10, 0.0 }
 0x51b   : > { %v2282_v11 = vmax.f32 %v2218_v37, 0.0 }
 0x51c   : > { %v2313_v43 = vpack.c.bf16 %v2284_v13, %v2283_v41  ;;  %v2638_v42 = vpop.permute.xlu1 %2637 }
 0x51d   : > { %v2312_v50 = vpack.c.bf16 %v2282_v11, %v2281_v16  ;;  %v3291_v47 = vpop.f32.mrb[88].mxu0 }
 0x51e   : > { %v2239_v58 = vadd.f32 %v3291_v47, %v4194_v6  ;;  %v2230_v53 = vpop.f32.mrb[89].mxu0 }
 0x51f   : > { %v2231_v61 = vadd.f32 %v4194_v6, %v2230_v53  ;;  %v3292_v56 = vpop.f32.mrb[90].mxu0  ;;  %3325 = vmatprep.mubr.msk.bf16.mxu1 %vm733_vm1, %v2312_v50 }
 0x520   : > { %v2242_v17 = vadd.f32 %v3292_v56, %v4194_v6  ;;  %v2233_v44 = vpop.f32.mrb[91].mxu0  ;;  %3326 = vmatmul.mubr.msk.bf16.gmra.mrb[84].mxu1 %vm733_vm1, %v2313_v43  ;;  %v2287_v22 = vmax.f32 %v2239_v58, 0.0  ;;  %v2642_v46 = vpop.permute.xlu1 %2641 }
 0x521   : > { %v2234_v20 = vadd.f32 %v4194_v6, %v2233_v44  ;;  %v2285_v26 = vmax.f32 %v2231_v61, 0.0 }
 0x522   : > { %v2288_v24 = vmax.f32 %v2242_v17, 0.0 }
 0x523   : > { %v2286_v59 = vmax.f32 %v2234_v20, 0.0 }
 0x524   : > { %v2315_v48 = vpack.c.bf16 %v2288_v24, %v2287_v22  ;;  %v2646_v51 = vpop.permute.xlu1 %2645 }
 0x525   : > { %v2314_v55 = vpack.c.bf16 %v2286_v59, %v2285_v26 }
 0x527   : > { %3329 = vmatprep.mubr.msk.bf16.mxu1 %vm733_vm1, %v2314_v55  ;;  %v3295_v62 = vpop.f32.mrb[92].mxu0 }
 0x528   : > { %3330 = vmatmul.mubr.msk.bf16.gmra.mrb[88].mxu1 %vm733_vm1, %v2315_v48  ;;  %v2255_v1 = vadd.f32 %v3295_v62, %v4194_v6  ;;  %v2246_v29 = vpop.f32.mrb[93].mxu0  ;;  %v2650_v16 = vpop.permute.xlu1 %2649 }
 0x529   : > { %v2247_v49 = vadd.f32 %v4194_v6, %v2246_v29  ;;  %v3296_v31 = vpop.f32.mrb[94].mxu0 }
 0x52a   : > { %v2258_v36 = vadd.f32 %v3296_v31, %v4194_v6  ;;  %v2249_v32 = vpop.f32.mrb[95].mxu0  ;;  %v2291_v30 = vmax.f32 %v2255_v1, 0.0 }
 0x52b   : > { %v2250_v63 = vadd.f32 %v4194_v6, %v2249_v32  ;;  %v2289_v2 = vmax.f32 %v2247_v49, 0.0  ;;  %v2636_v6 = vpop.permute.xlu0 %2635 }
 0x52c   : > { %v2292_v35 = vmax.f32 %v2258_v36, 0.0  ;;  %v2654_v44 = vpop.permute.xlu1 %2653 }
 0x52d   : > { %v2290_v38 = vmax.f32 %v2250_v63, 0.0 }
 0x52e   : > { %v2317_v39 = vpack.c.bf16 %v2292_v35, %v2291_v30 }
 0x52f   : > { %v2316_v5 = vpack.c.bf16 %v2290_v38, %v2289_v2  ;;  %v2640_v52 = vpop.permute.xlu0 %2639 }
 0x530   : > { %v2658_v1 = vpop.permute.xlu1 %2657 }
 0x531   : > { %3333 = vmatprep.mubr.msk.bf16.mxu1 %vm733_vm1, %v2316_v5 }
 0x532   : > { %3334 = vmatmul.mubr.msk.bf16.gmra.mrb[92].mxu1 %vm733_vm1, %v2317_v39 }
 0x533   : > { %v2644_v7 = vpop.permute.xlu0 %2643 }
 0x534   : > { %v2662_v63 = vpop.permute.xlu1 %2661 }
 0x537   : > { %v2648_v13 = vpop.permute.xlu0 %2647 }
 0x53b   : > { %v2652_v56 = vpop.permute.xlu0 %2651 }
 0x53f   : > { %v2656_v26 = vpop.permute.xlu0 %2655 }
 0x543   : > { %v2660_v49 = vpop.permute.xlu0 %2659 }
 0x547   : > { %v2664_v5 = vpop.permute.xlu0 %2663 }
 0x5cb   : > { %v3307_v3 = vpop.f32.mrb[64].mxu1 }
 0x5cc   : > { %v2437_v18 = vadd.f32 %v3307_v3, %v4247_v12  ;;  %v2428_v4 = vpop.f32.mrb[65].mxu1 }
 0x5cd   : > { %v2429_v54 = vadd.f32 %v4247_v12, %v2428_v4  ;;  %v3308_v45 = vpop.f32.mrb[66].mxu1 }
 0x5ce   : > { %2557 = vst.msk [vmem:[%s4254_s15 + $0x10] sm:$0xff] %vm438_vm0, %v2437_v18  ;;  %v2440_v15 = vadd.f32 %v3308_v45, %v4247_v12  ;;  %v2431_v28 = vpop.f32.mrb[67].mxu1 }
 0x5cf   : > { %2718 = vst.msk [vmem:[%s4254_s15 + $0x10] sm:$0xff] %vm2715_vm7, %v2624_v19  ;;  %v2432_v21 = vadd.f32 %v4247_v12, %v2431_v28 }
 0x5d0   : > { %2555 = vst.msk [vmem:[%s4254_s15] sm:$0xff] %vm438_vm0, %v2429_v54  ;;  %2558 = vst.msk [vmem:[%s4254_s15 + $0x18] sm:$0xff] %vm438_vm0, %v2440_v15 }
 0x5d1   : > { %2716 = vst.msk [vmem:[%s4254_s15] sm:$0xff] %vm2715_vm7, %v2620_v14  ;;  %2719 = vst.msk [vmem:[%s4254_s15 + $0x18] sm:$0xff] %vm2715_vm7, %v2626_v27  ;;  %v2666_v14 = vpop.permute.xlu1 %2665 }
 0x5d2   : > { %2556 = vst.msk [vmem:[%s4254_s15 + $0x8] sm:$0xff] %vm438_vm0, %v2432_v21 }
 0x5d3   : > { %2717 = vst.msk [vmem:[%s4254_s15 + $0x8] sm:$0xff] %vm2715_vm7, %v2622_v23  ;;  %v3311_v57 = vpop.f32.mrb[68].mxu1 }
 0x5d4   : > { %v2453_v0 = vadd.f32 %v3311_v57, %v4247_v12  ;;  %v2444_v60 = vpop.f32.mrb[69].mxu1 }
 0x5d5   : > { %v2445_v9 = vadd.f32 %v4247_v12, %v2444_v60  ;;  %v3312_v10 = vpop.f32.mrb[70].mxu1  ;;  %v2670_v3 = vpop.permute.xlu1 %2669 }
 0x5d6   : > { %2561 = vst.msk [vmem:[%s4254_s15 + $0x30] sm:$0xff] %vm438_vm0, %v2453_v0  ;;  %v2456_v33 = vadd.f32 %v3312_v10, %v4247_v12  ;;  %v2447_v37 = vpop.f32.mrb[71].mxu1 }
 0x5d7   : > { %2722 = vst.msk [vmem:[%s4254_s15 + $0x30] sm:$0xff] %vm2715_vm7, %v2632_v25  ;;  %v2448_v41 = vadd.f32 %v4247_v12, %v2447_v37 }
 0x5d8   : > { %2559 = vst.msk [vmem:[%s4254_s15 + $0x20] sm:$0xff] %vm438_vm0, %v2445_v9  ;;  %2562 = vst.msk [vmem:[%s4254_s15 + $0x38] sm:$0xff] %vm438_vm0, %v2456_v33 }
 0x5d9   : > { %2720 = vst.msk [vmem:[%s4254_s15 + $0x20] sm:$0xff] %vm2715_vm7, %v2628_v34  ;;  %2723 = vst.msk [vmem:[%s4254_s15 + $0x38] sm:$0xff] %vm2715_vm7, %v2634_v40  ;;  %v2674_v21 = vpop.permute.xlu1 %2673 }
 0x5da   : > { %2560 = vst.msk [vmem:[%s4254_s15 + $0x28] sm:$0xff] %vm438_vm0, %v2448_v41 }
 0x5db   : > { %2721 = vst.msk [vmem:[%s4254_s15 + $0x28] sm:$0xff] %vm2715_vm7, %v2630_v8  ;;  %v3315_v11 = vpop.f32.mrb[72].mxu1 }
 0x5dc   : > { %v2469_v43 = vadd.f32 %v3315_v11, %v4247_v12  ;;  %v2460_v50 = vpop.f32.mrb[73].mxu1 }
 0x5dd   : > { %v2461_v47 = vadd.f32 %v4247_v12, %v2460_v50  ;;  %v3316_v58 = vpop.f32.mrb[74].mxu1  ;;  %v2678_v0 = vpop.permute.xlu1 %2677 }
 0x5de   : > { %2565 = vst.msk [vmem:[%s4254_s15 + $0x50] sm:$0xff] %vm438_vm0, %v2469_v43  ;;  %v2472_v53 = vadd.f32 %v3316_v58, %v4247_v12  ;;  %v2463_v61 = vpop.f32.mrb[75].mxu1 }
 0x5df   : > { %2726 = vst.msk [vmem:[%s4254_s15 + $0x50] sm:$0xff] %vm2715_vm7, %v2640_v52  ;;  %v2464_v17 = vadd.f32 %v4247_v12, %v2463_v61 }
 0x5e0   : > { %2563 = vst.msk [vmem:[%s4254_s15 + $0x40] sm:$0xff] %vm438_vm0, %v2461_v47  ;;  %2566 = vst.msk [vmem:[%s4254_s15 + $0x58] sm:$0xff] %vm438_vm0, %v2472_v53 }
 0x5e1   : > { %2724 = vst.msk [vmem:[%s4254_s15 + $0x40] sm:$0xff] %vm2715_vm7, %v2636_v6  ;;  %2727 = vst.msk [vmem:[%s4254_s15 + $0x58] sm:$0xff] %vm2715_vm7, %v2642_v46  ;;  %v2668_v6 = vpop.permute.xlu0 %2667  ;;  %v2682_v11 = vpop.permute.xlu1 %2681 }
 0x5e2   : > { %2564 = vst.msk [vmem:[%s4254_s15 + $0x48] sm:$0xff] %vm438_vm0, %v2464_v17 }
 0x5e3   : > { %2725 = vst.msk [vmem:[%s4254_s15 + $0x48] sm:$0xff] %vm2715_vm7, %v2638_v42  ;;  %v3319_v20 = vpop.f32.mrb[76].mxu1 }
 0x5e4   : > { %v2485_v22 = vadd.f32 %v3319_v20, %v4247_v12  ;;  %v2476_v24 = vpop.f32.mrb[77].mxu1 }
 0x5e5   : > { %v2477_v59 = vadd.f32 %v4247_v12, %v2476_v24  ;;  %v3320_v48 = vpop.f32.mrb[78].mxu1  ;;  %v2672_v54 = vpop.permute.xlu0 %2671 }
 0x5e6   : > { %2569 = vst.msk [vmem:[%s4254_s15 + $0x70] sm:$0xff] %vm438_vm0, %v2485_v22  ;;  %v2488_v55 = vadd.f32 %v3320_v48, %v4247_v12  ;;  %v2479_v62 = vpop.f32.mrb[79].mxu1 }
 0x5e7   : > { %2730 = vst.msk [vmem:[%s4254_s15 + $0x70] sm:$0xff] %vm2715_vm7, %v2648_v13  ;;  %v2480_v29 = vadd.f32 %v4247_v12, %v2479_v62 }
 0x5e8   : > { %2567 = vst.msk [vmem:[%s4254_s15 + $0x60] sm:$0xff] %vm438_vm0, %v2477_v59  ;;  %2570 = vst.msk [vmem:[%s4254_s15 + $0x78] sm:$0xff] %vm438_vm0, %v2488_v55 }
 0x5e9   : > { %2728 = vst.msk [vmem:[%s4254_s15 + $0x60] sm:$0xff] %vm2715_vm7, %v2644_v7  ;;  %2731 = vst.msk [vmem:[%s4254_s15 + $0x78] sm:$0xff] %vm2715_vm7, %v2650_v16  ;;  %v2676_v57 = vpop.permute.xlu0 %2675 }
 0x5ea   : > { %2568 = vst.msk [vmem:[%s4254_s15 + $0x68] sm:$0xff] %vm438_vm0, %v2480_v29 }
 0x5eb   : > { %2729 = vst.msk [vmem:[%s4254_s15 + $0x68] sm:$0xff] %vm2715_vm7, %v2646_v51  ;;  %v3323_v31 = vpop.f32.mrb[80].mxu1 }
 0x5ec   : > { %v2501_v36 = vadd.f32 %v3323_v31, %v4247_v12  ;;  %v2492_v32 = vpop.f32.mrb[81].mxu1 }
 0x5ed   : > { %v2493_v30 = vadd.f32 %v4247_v12, %v2492_v32  ;;  %v3324_v35 = vpop.f32.mrb[82].mxu1  ;;  %v2680_v37 = vpop.permute.xlu0 %2679 }
 0x5ee   : > { %2573 = vst.msk [vmem:[%s4254_s15 + $0x90] sm:$0xff] %vm438_vm0, %v2501_v36  ;;  %v2504_v2 = vadd.f32 %v3324_v35, %v4247_v12  ;;  %v2495_v38 = vpop.f32.mrb[83].mxu1 }
 0x5ef   : > { %2734 = vst.msk [vmem:[%s4254_s15 + $0x90] sm:$0xff] %vm2715_vm7, %v2656_v26  ;;  %v2496_v39 = vadd.f32 %v4247_v12, %v2495_v38 }
 0x5f0   : > { %2571 = vst.msk [vmem:[%s4254_s15 + $0x80] sm:$0xff] %vm438_vm0, %v2493_v30  ;;  %2574 = vst.msk [vmem:[%s4254_s15 + $0x98] sm:$0xff] %vm438_vm0, %v2504_v2 }
 0x5f1   : > { %2732 = vst.msk [vmem:[%s4254_s15 + $0x80] sm:$0xff] %vm2715_vm7, %v2652_v56  ;;  %2735 = vst.msk [vmem:[%s4254_s15 + $0x98] sm:$0xff] %vm2715_vm7, %v2658_v1 }
 0x5f2   : > { %2572 = vst.msk [vmem:[%s4254_s15 + $0x88] sm:$0xff] %vm438_vm0, %v2496_v39 }
 0x5f3   : > { %2733 = vst.msk [vmem:[%s4254_s15 + $0x88] sm:$0xff] %vm2715_vm7, %v2654_v44  ;;  %v3327_v23 = vpop.f32.mrb[84].mxu1 }
 0x5f4   : > { %v2517_v19 = vadd.f32 %v3327_v23, %v4247_v12  ;;  %v2508_v27 = vpop.f32.mrb[85].mxu1 }
 0x5f5   : > { %v2509_v34 = vadd.f32 %v4247_v12, %v2508_v27  ;;  %v3328_v8 = vpop.f32.mrb[86].mxu1 }
 0x5f6   : > { %2577 = vst.msk [vmem:[%s4254_s15 + $0xb0] sm:$0xff] %vm438_vm0, %v2517_v19  ;;  %v2520_v25 = vadd.f32 %v3328_v8, %v4247_v12  ;;  %v2511_v40 = vpop.f32.mrb[87].mxu1 }
 0x5f7   : > { %2738 = vst.msk [vmem:[%s4254_s15 + $0xb0] sm:$0xff] %vm2715_vm7, %v2664_v5  ;;  %v2512_v42 = vadd.f32 %v4247_v12, %v2511_v40 }
 0x5f8   : > { %2575 = vst.msk [vmem:[%s4254_s15 + $0xa0] sm:$0xff] %vm438_vm0, %v2509_v34  ;;  %2578 = vst.msk [vmem:[%s4254_s15 + $0xb8] sm:$0xff] %vm438_vm0, %v2520_v25 }
 0x5f9   : > { %2736 = vst.msk [vmem:[%s4254_s15 + $0xa0] sm:$0xff] %vm2715_vm7, %v2660_v49  ;;  %2739 = vst.msk [vmem:[%s4254_s15 + $0xb8] sm:$0xff] %vm2715_vm7, %v2666_v14 }
 0x5fa   : > { %2576 = vst.msk [vmem:[%s4254_s15 + $0xa8] sm:$0xff] %vm438_vm0, %v2512_v42 }
 0x5fb   : > { %2737 = vst.msk [vmem:[%s4254_s15 + $0xa8] sm:$0xff] %vm2715_vm7, %v2662_v63  ;;  %v3331_v18 = vpop.f32.mrb[88].mxu1 }
 0x5fc   : > { %v2533_v4 = vadd.f32 %v3331_v18, %v4247_v12  ;;  %v2524_v52 = vpop.f32.mrb[89].mxu1 }
 0x5fd   : > { %v2525_v45 = vadd.f32 %v4247_v12, %v2524_v52  ;;  %v3332_v15 = vpop.f32.mrb[90].mxu1 }
 0x5fe   : > { %2581 = vst.msk [vmem:[%s4254_s15 + $0xd0] sm:$0xff] %vm438_vm0, %v2533_v4  ;;  %v2536_v28 = vadd.f32 %v3332_v15, %v4247_v12  ;;  %v2527_v46 = vpop.f32.mrb[91].mxu1 }
 0x5ff   : > { %2742 = vst.msk [vmem:[%s4254_s15 + $0xd0] sm:$0xff] %vm2715_vm7, %v2672_v54  ;;  %v2528_v7 = vadd.f32 %v4247_v12, %v2527_v46 }
 0x600   : > { %2579 = vst.msk [vmem:[%s4254_s15 + $0xc0] sm:$0xff] %vm438_vm0, %v2525_v45  ;;  %2582 = vst.msk [vmem:[%s4254_s15 + $0xd8] sm:$0xff] %vm438_vm0, %v2536_v28 }
 0x601   : > { %2740 = vst.msk [vmem:[%s4254_s15 + $0xc0] sm:$0xff] %vm2715_vm7, %v2668_v6  ;;  %2743 = vst.msk [vmem:[%s4254_s15 + $0xd8] sm:$0xff] %vm2715_vm7, %v2674_v21 }
 0x602   : > { %2580 = vst.msk [vmem:[%s4254_s15 + $0xc8] sm:$0xff] %vm438_vm0, %v2528_v7 }
 0x603   : > { %2741 = vst.msk [vmem:[%s4254_s15 + $0xc8] sm:$0xff] %vm2715_vm7, %v2670_v3 }
 0x605   : > { %v3335_v60 = vpop.f32.mrb[92].mxu1 }
 0x606   : > { %v2549_v51 = vadd.f32 %v3335_v60, %v4247_v12  ;;  %v2540_v9 = vpop.f32.mrb[93].mxu1 }
 0x607   : > { %v2541_v10 = vadd.f32 %v4247_v12, %v2540_v9  ;;  %v3336_v33 = vpop.f32.mrb[94].mxu1 }
 0x608   : > { %2585 = vst.msk [vmem:[%s4254_s15 + $0xf0] sm:$0xff] %vm438_vm0, %v2549_v51  ;;  %v2552_v41 = vadd.f32 %v3336_v33, %v4247_v12  ;;  %v2543_v13 = vpop.f32.mrb[95].mxu1 }
 0x609   : > { %2746 = vst.msk [vmem:[%s4254_s15 + $0xf0] sm:$0xff] %vm2715_vm7, %v2680_v37  ;;  %v2544_v16 = vadd.f32 %v4247_v12, %v2543_v13 }
 0x60a   : > { %2583 = vst.msk [vmem:[%s4254_s15 + $0xe0] sm:$0xff] %vm438_vm0, %v2541_v10  ;;  %2586 = vst.msk [vmem:[%s4254_s15 + $0xf8] sm:$0xff] %vm438_vm0, %v2552_v41 }
 0x60b   : > { %2744 = vst.msk [vmem:[%s4254_s15 + $0xe0] sm:$0xff] %vm2715_vm7, %v2676_v57  ;;  %2747 = vst.msk [vmem:[%s4254_s15 + $0xf8] sm:$0xff] %vm2715_vm7, %v2682_v11 }
 0x60c   : > { %2584 = vst.msk [vmem:[%s4254_s15 + $0xe8] sm:$0xff] %vm438_vm0, %v2544_v16 }
 0x60d   : > { %2745 = vst.msk [vmem:[%s4254_s15 + $0xe8] sm:$0xff] %vm2715_vm7, %v2678_v0 }
 0x60e PF: > { %s15_s18 = sadd.s32 1, %s3469_s18  }
 0x60f   : > { %p12_p4 = scmp.ge.s32.totalorder %s15_s18, 4  }
 0x611   :  { %14 = sbr.rel (!%p12_p4) target bundleno = 1 (0x1), region = 76 }

</bundles_post_ra>
